<compile_context>
chip_gen: v6e
topology: v6e:2x2x1
jax: 0.10.0
libtpu: 0.0.40
codegen_flags: <defaults>
</compile_context>

<pallas_src>
import math
import jax
import jax.numpy as jnp
from jax import lax
from jax.experimental import pallas as pl
from jax.experimental.pallas import tpu as pltpu  # noqa: F401  (TPU backend assumed)

# ---------------------------- model dimensions -----------------------------
B      = 2    # batch
S_TGT  = 8    # target sequence length
S_SRC  = 8    # source (memory) sequence length
D      = 32   # d_model (== DecoderLayer.size)
H      = 4    # attention heads
D_K    = D // H
D_FF   = 64   # feed-forward hidden
EPS    = 1e-6
NEG    = -1e9


# ------------------------------ kernel helpers ------------------------------
def _layer_norm(x, a, b):
    # Matches the PyTorch LayerNorm of the spec: torch.std uses Bessel correction
    # (divide by N-1) and eps is added to std, not to variance.
    d = x.shape[-1]
    mean = jnp.mean(x, axis=-1, keepdims=True)
    var = jnp.sum((x - mean) ** 2, axis=-1, keepdims=True) / (d - 1)
    std = jnp.sqrt(var)
    return a * (x - mean) / (std + EPS) + b


def _softmax(s):
    m = jnp.max(s, axis=-1, keepdims=True)
    e = jnp.exp(s - m)
    return e * pl.reciprocal(jnp.sum(e, axis=-1, keepdims=True), approx=True)


def _attend(q, k, v, bias, wo, bo):
    # q: (Rq, D), k/v: (Rk, D), bias: (Rq, Rk) additive (0 allowed / -1e9 masked,
    # block-diagonal across folded batches).
    scale = 1.0 / math.sqrt(D_K)
    heads = []
    for h in range(H):                       # static unroll, H=4
        lo, hi = h * D_K, (h + 1) * D_K
        qh, kh, vh = q[:, lo:hi], k[:, lo:hi], v[:, lo:hi]
        # contraction on the last dim of both operands -> no materialized transpose
        scores = lax.dot_general(qh, kh, (((1,), (1,)), ((), ())),
                                 preferred_element_type=jnp.float32)
        scores = scores * scale + bias
        p = _softmax(scores)
        heads.append(jnp.dot(p, vh, preferred_element_type=jnp.float32))
    cat = jnp.concatenate(heads, axis=-1)    # (Rq, D)
    return jnp.dot(cat, wo, preferred_element_type=jnp.float32) + bo


# -------------------------------- the kernel --------------------------------
def decoder_layer_kernel(x_ref, mem_ref, tbias_ref, sbias_ref,
                         ln0a_ref, ln0b_ref, ln1a_ref, ln1b_ref, ln2a_ref, ln2b_ref,
                         wqkv_ref, bqkv_ref, wo_ref, bo_ref,
                         w1_ref, b1_ref, w2_ref, b2_ref,
                         out_ref):
    x   = x_ref[...]          # (B*S_TGT, D)
    mem = mem_ref[...]        # (B*S_SRC, D)
    tbias = tbias_ref[...]    # (B*S_TGT, B*S_TGT)
    sbias = sbias_ref[...]    # (B*S_TGT, B*S_SRC)

    wqkv, bqkv = wqkv_ref[...], bqkv_ref[...]     # (D, 3D), (1, 3D)
    wo, bo = wo_ref[...], bo_ref[...]

    # --- sublayer 0: x + self_attn(LN(x), LN(x), LN(x), tgt_mask) ---
    n0 = _layer_norm(x, ln0a_ref[...], ln0b_ref[...])
    qkv = jnp.dot(n0, wqkv, preferred_element_type=jnp.float32) + bqkv   # fused QKV
    x = x + _attend(qkv[:, 0:D], qkv[:, D:2 * D], qkv[:, 2 * D:3 * D], tbias, wo, bo)

    # --- sublayer 1: x + self_attn(LN(x), memory, memory, src_mask) ---
    # (reference code reuses self_attn weights here)
    n1 = _layer_norm(x, ln1a_ref[...], ln1b_ref[...])
    q = jnp.dot(n1, wqkv[:, 0:D], preferred_element_type=jnp.float32) + bqkv[:, 0:D]
    kv = jnp.dot(mem, wqkv[:, D:3 * D], preferred_element_type=jnp.float32) + bqkv[:, D:3 * D]
    x = x + _attend(q, kv[:, 0:D], kv[:, D:2 * D], sbias, wo, bo)

    # --- sublayer 2: x + FFN(LN(x)) ---
    n2 = _layer_norm(x, ln2a_ref[...], ln2b_ref[...])
    h = jnp.maximum(jnp.dot(n2, w1_ref[...], preferred_element_type=jnp.float32)
                    + b1_ref[...], 0.0)
    ff = jnp.dot(h, w2_ref[...], preferred_element_type=jnp.float32) + b2_ref[...]

    out_ref[...] = (x + ff).astype(out_ref.dtype)


# -------------------------------- wrapper -----------------------------------
def decoder_layer(x, memory, tgt_mask, src_mask, params):
    batch, s_tgt, d = x.shape
    s_src = memory.shape[1]

    # Fold batch into the row (sublane) dimension.
    x2 = x.reshape(batch * s_tgt, d)
    mem2 = memory.reshape(batch * s_src, d)

    # Block-diagonal additive mask biases: 0 where attention allowed, -1e9 otherwise.
    def block_diag_bias(mask):
        allowed = jnp.kron(jnp.eye(batch, dtype=jnp.float32), mask.astype(jnp.float32))
        return jnp.where(allowed == 0.0, NEG, 0.0).astype(jnp.float32)

    tbias = block_diag_bias(tgt_mask)   # (B*S_TGT, B*S_TGT)
    sbias = block_diag_bias(src_mask)   # (B*S_TGT, B*S_SRC)

    # Fuse the Q/K/V projection weights into one (D, 3D) matmul operand.
    wqkv = jnp.concatenate([params["wq"], params["wk"], params["wv"]], axis=1)
    bqkv = jnp.concatenate([params["bq"], params["bk"], params["bv"]], axis=1)

    operands = (
        x2, mem2, tbias, sbias,
        params["ln0_a"], params["ln0_b"], params["ln1_a"], params["ln1_b"],
        params["ln2_a"], params["ln2_b"],
        wqkv, bqkv, params["wo"], params["bo"],
        params["w1"], params["b1"], params["w2"], params["b2"],
    )

    # Single invocation, no grid: every operand is a whole-array VMEM block and the
    # output is one contiguous (B*S_TGT, D) store.
    out2 = pl.pallas_call(
        decoder_layer_kernel,
        out_shape=jax.ShapeDtypeStruct((batch * s_tgt, d), jnp.float32),
    )(*operands)
    return out2.reshape(batch, s_tgt, d)


# ---------------------- pure-JAX reference (for checking) -------------------
def _ref_ln(x, a, b):
    d = x.shape[-1]
    mean = jnp.mean(x, axis=-1, keepdims=True)
    var = jnp.sum((x - mean) ** 2, axis=-1, keepdims=True) / (d - 1)
    return a * (x - mean) / (jnp.sqrt(var) + EPS) + b


def _ref_mha(q_in, kv_in, mask, p):
    q = q_in @ p["wq"] + p["bq"]
    k = kv_in @ p["wk"] + p["bk"]
    v = kv_in @ p["wv"] + p["bv"]

    def split(t):  # (B, S, D) -> (B, H, S, D_K)
        bsz, s, _ = t.shape
        return t.reshape(bsz, s, H, D_K).transpose(0, 2, 1, 3)

    qh, kh, vh = split(q), split(k), split(v)
    scores = jnp.einsum("bhqd,bhkd->bhqk", qh, kh) / math.sqrt(D_K)
    scores = jnp.where(mask[None, None] == 0.0, NEG, scores)
    probs = jax.nn.softmax(scores, axis=-1)
    o = jnp.einsum("bhqk,bhkd->bhqd", probs, vh)
    o = o.transpose(0, 2, 1, 3).reshape(q_in.shape[0], q_in.shape[1], D)
    return o @ p["wo"] + p["bo"]


def decoder_layer_ref(x, memory, tgt_mask, src_mask, p):
    n0 = _ref_ln(x, p["ln0_a"], p["ln0_b"])
    x = x + _ref_mha(n0, n0, tgt_mask, p)
    n1 = _ref_ln(x, p["ln1_a"], p["ln1_b"])
    x = x + _ref_mha(n1, memory, src_mask, p)
    n2 = _ref_ln(x, p["ln2_a"], p["ln2_b"])
    ff = jnp.maximum(n2 @ p["w1"] + p["b1"], 0.0) @ p["w2"] + p["b2"]
    return x + ff


# ----------------------------------- main ------------------------------------
if __name__ == "__main__":
    key = jax.random.PRNGKey(0)
    ks = jax.random.split(key, 16)

    x      = jax.random.normal(ks[0], (B, S_TGT, D), dtype=jnp.float32)
    memory = jax.random.normal(ks[1], (B, S_SRC, D), dtype=jnp.float32)

    # causal mask for self-attention, all-ones mask for cross-attention
    tgt_mask = jnp.tril(jnp.ones((S_TGT, S_TGT), dtype=jnp.float32))
    src_mask = jnp.ones((S_TGT, S_SRC), dtype=jnp.float32)

    def lin(k, fan_in, fan_out):
        return jax.random.normal(k, (fan_in, fan_out), dtype=jnp.float32) * 0.05

    params = {
        # LayerNorm params (one per SublayerConnection), kept (1, D) for TPU layout
        "ln0_a": jnp.ones((1, D), jnp.float32),  "ln0_b": jnp.zeros((1, D), jnp.float32),
        "ln1_a": jnp.ones((1, D), jnp.float32),  "ln1_b": jnp.zeros((1, D), jnp.float32),
        "ln2_a": jnp.ones((1, D), jnp.float32),  "ln2_b": jnp.zeros((1, D), jnp.float32),
        # self_attn (4 linears d_model -> d_model); src_attn is unused in forward
        "wq": lin(ks[2], D, D), "bq": jax.random.normal(ks[3], (1, D)) * 0.01,
        "wk": lin(ks[4], D, D), "bk": jax.random.normal(ks[5], (1, D)) * 0.01,
        "wv": lin(ks[6], D, D), "bv": jax.random.normal(ks[7], (1, D)) * 0.01,
        "wo": lin(ks[8], D, D), "bo": jax.random.normal(ks[9], (1, D)) * 0.01,
        # positionwise feed-forward
        "w1": lin(ks[10], D, D_FF), "b1": jax.random.normal(ks[11], (1, D_FF)) * 0.01,
        "w2": lin(ks[12], D_FF, D), "b2": jax.random.normal(ks[13], (1, D)) * 0.01,
    }

    out = decoder_layer(x, memory, tgt_mask, src_mask, params)
    out = jax.block_until_ready(out)

    ref = decoder_layer_ref(x, memory, tgt_mask, src_mask, params)
    assert out.shape == (B, S_TGT, D)
    assert jnp.allclose(out, ref, rtol=1e-3, atol=1e-3), "mismatch vs JAX reference"

    print("KERNEL_OK")
</pallas_src>

<mosaic_0001>
module attributes {stable_mosaic.version = 11 : i64} {
  func.func @decoder_layer_kernel(%arg0: memref<16x32xf32, #tpu.memory_space<vmem>>, %arg1: memref<16x32xf32, #tpu.memory_space<vmem>>, %arg2: memref<16x16xf32, #tpu.memory_space<vmem>>, %arg3: memref<16x16xf32, #tpu.memory_space<vmem>>, %arg4: memref<1x32xf32, #tpu.memory_space<vmem>>, %arg5: memref<1x32xf32, #tpu.memory_space<vmem>>, %arg6: memref<1x32xf32, #tpu.memory_space<vmem>>, %arg7: memref<1x32xf32, #tpu.memory_space<vmem>>, %arg8: memref<1x32xf32, #tpu.memory_space<vmem>>, %arg9: memref<1x32xf32, #tpu.memory_space<vmem>>, %arg10: memref<32x96xf32, #tpu.memory_space<vmem>>, %arg11: memref<1x96xf32, #tpu.memory_space<vmem>>, %arg12: memref<32x32xf32, #tpu.memory_space<vmem>>, %arg13: memref<1x32xf32, #tpu.memory_space<vmem>>, %arg14: memref<32x64xf32, #tpu.memory_space<vmem>>, %arg15: memref<1x64xf32, #tpu.memory_space<vmem>>, %arg16: memref<64x32xf32, #tpu.memory_space<vmem>>, %arg17: memref<1x32xf32, #tpu.memory_space<vmem>>, %arg18: memref<16x32xf32, #tpu.memory_space<vmem>>) attributes {dimension_semantics = [], scalar_prefetch = 0 : i64, scratch_operands = 0 : i64, tpu.core_type = #tpu.core_type<tc>} {
    %c0 = arith.constant 0 : index
    %c0_0 = arith.constant 0 : index
    %0 = vector.load %arg0[%c0, %c0_0] : memref<16x32xf32, #tpu.memory_space<vmem>>, vector<16x32xf32>
    %c0_1 = arith.constant 0 : index
    %c0_2 = arith.constant 0 : index
    %1 = vector.load %arg1[%c0_1, %c0_2] : memref<16x32xf32, #tpu.memory_space<vmem>>, vector<16x32xf32>
    %c0_3 = arith.constant 0 : index
    %c0_4 = arith.constant 0 : index
    %2 = vector.load %arg2[%c0_3, %c0_4] : memref<16x16xf32, #tpu.memory_space<vmem>>, vector<16x16xf32>
    %c0_5 = arith.constant 0 : index
    %c0_6 = arith.constant 0 : index
    %3 = vector.load %arg3[%c0_5, %c0_6] : memref<16x16xf32, #tpu.memory_space<vmem>>, vector<16x16xf32>
    %c0_7 = arith.constant 0 : index
    %c0_8 = arith.constant 0 : index
    %4 = vector.load %arg10[%c0_7, %c0_8] : memref<32x96xf32, #tpu.memory_space<vmem>>, vector<32x96xf32>
    %c0_9 = arith.constant 0 : index
    %c0_10 = arith.constant 0 : index
    %5 = vector.load %arg11[%c0_9, %c0_10] : memref<1x96xf32, #tpu.memory_space<vmem>>, vector<1x96xf32>
    %c0_11 = arith.constant 0 : index
    %c0_12 = arith.constant 0 : index
    %6 = vector.load %arg12[%c0_11, %c0_12] : memref<32x32xf32, #tpu.memory_space<vmem>>, vector<32x32xf32>
    %c0_13 = arith.constant 0 : index
    %c0_14 = arith.constant 0 : index
    %7 = vector.load %arg13[%c0_13, %c0_14] : memref<1x32xf32, #tpu.memory_space<vmem>>, vector<1x32xf32>
    %c0_15 = arith.constant 0 : index
    %c0_16 = arith.constant 0 : index
    %8 = vector.load %arg4[%c0_15, %c0_16] : memref<1x32xf32, #tpu.memory_space<vmem>>, vector<1x32xf32>
    %c0_17 = arith.constant 0 : index
    %c0_18 = arith.constant 0 : index
    %9 = vector.load %arg5[%c0_17, %c0_18] : memref<1x32xf32, #tpu.memory_space<vmem>>, vector<1x32xf32>
    %cst = arith.constant dense<0.000000e+00> : vector<16xf32>
    %10 = vector.multi_reduction <add>, %0, %cst [1] : vector<16x32xf32> to vector<16xf32>
    %11 = vector.shape_cast %10 : vector<16xf32> to vector<16x1xf32>
    %cst_19 = arith.constant 3.200000e+01 : f32
    %12 = vector.broadcast %cst_19 : f32 to vector<16x1xf32>
    %13 = arith.divf %11, %12 : vector<16x1xf32>
    %14 = vector.broadcast %13 : vector<16x1xf32> to vector<16x32xf32>
    %15 = arith.subf %0, %14 : vector<16x32xf32>
    %16 = arith.mulf %15, %15 : vector<16x32xf32>
    %cst_20 = arith.constant dense<0.000000e+00> : vector<16xf32>
    %17 = vector.multi_reduction <add>, %16, %cst_20 [1] : vector<16x32xf32> to vector<16xf32>
    %18 = vector.shape_cast %17 : vector<16xf32> to vector<16x1xf32>
    %cst_21 = arith.constant 3.100000e+01 : f32
    %19 = vector.broadcast %cst_21 : f32 to vector<16x1xf32>
    %20 = arith.divf %18, %19 : vector<16x1xf32>
    %21 = math.sqrt %20 : vector<16x1xf32>
    %22 = vector.broadcast %13 : vector<16x1xf32> to vector<16x32xf32>
    %23 = arith.subf %0, %22 : vector<16x32xf32>
    %24 = vector.broadcast %8 : vector<1x32xf32> to vector<16x32xf32>
    %25 = arith.mulf %24, %23 : vector<16x32xf32>
    %cst_22 = arith.constant 9.99999997E-7 : f32
    %26 = vector.broadcast %cst_22 : f32 to vector<16x1xf32>
    %27 = arith.addf %21, %26 : vector<16x1xf32>
    %28 = vector.broadcast %27 : vector<16x1xf32> to vector<16x32xf32>
    %29 = arith.divf %25, %28 : vector<16x32xf32>
    %30 = vector.broadcast %9 : vector<1x32xf32> to vector<16x32xf32>
    %31 = arith.addf %29, %30 : vector<16x32xf32>
    %cst_23 = arith.constant dense<0.000000e+00> : vector<16x96xf32>
    %32 = tpu.matmul %31, %4, %cst_23 {dimension_numbers = #tpu.dot_dimension_numbers<[1], [0], [0], [1], [0, 0, 1, 1], [], []>} : vector<16x32xf32>, vector<32x96xf32>, vector<16x96xf32> -> vector<16x96xf32>
    %33 = vector.broadcast %5 : vector<1x96xf32> to vector<16x96xf32>
    %34 = arith.addf %32, %33 : vector<16x96xf32>
    %35 = vector.extract_strided_slice %34 {offsets = [0, 0], sizes = [16, 32], strides = [1, 1]} : vector<16x96xf32> to vector<16x32xf32>
    %36 = vector.extract_strided_slice %34 {offsets = [0, 32], sizes = [16, 32], strides = [1, 1]} : vector<16x96xf32> to vector<16x32xf32>
    %37 = vector.extract_strided_slice %34 {offsets = [0, 64], sizes = [16, 32], strides = [1, 1]} : vector<16x96xf32> to vector<16x32xf32>
    %38 = vector.extract_strided_slice %35 {offsets = [0, 0], sizes = [16, 8], strides = [1, 1]} : vector<16x32xf32> to vector<16x8xf32>
    %39 = vector.extract_strided_slice %36 {offsets = [0, 0], sizes = [16, 8], strides = [1, 1]} : vector<16x32xf32> to vector<16x8xf32>
    %40 = vector.extract_strided_slice %37 {offsets = [0, 0], sizes = [16, 8], strides = [1, 1]} : vector<16x32xf32> to vector<16x8xf32>
    %cst_24 = arith.constant dense<0.000000e+00> : vector<16x16xf32>
    %41 = tpu.matmul %38, %39, %cst_24 {dimension_numbers = #tpu.dot_dimension_numbers<[1], [1], [0], [0], [0, 0, 1, 0], [], []>} : vector<16x8xf32>, vector<16x8xf32>, vector<16x16xf32> -> vector<16x16xf32>
    %cst_25 = arith.constant 0.353553385 : f32
    %42 = vector.broadcast %cst_25 : f32 to vector<16x16xf32>
    %43 = arith.mulf %41, %42 : vector<16x16xf32>
    %44 = arith.addf %43, %2 : vector<16x16xf32>
    %cst_26 = arith.constant dense<0xFF800000> : vector<16xf32>
    %45 = vector.multi_reduction <maximumf>, %44, %cst_26 [1] : vector<16x16xf32> to vector<16xf32>
    %46 = vector.shape_cast %45 : vector<16xf32> to vector<16x1xf32>
    %47 = vector.broadcast %46 : vector<16x1xf32> to vector<16x16xf32>
    %48 = arith.subf %44, %47 : vector<16x16xf32>
    %49 = math.exp %48 : vector<16x16xf32>
    %cst_27 = arith.constant dense<0.000000e+00> : vector<16xf32>
    %50 = vector.multi_reduction <add>, %49, %cst_27 [1] : vector<16x16xf32> to vector<16xf32>
    %51 = vector.shape_cast %50 : vector<16xf32> to vector<16x1xf32>
    %52 = tpu.reciprocal %51 {approx = true} : vector<16x1xf32> -> vector<16x1xf32>
    %53 = vector.broadcast %52 : vector<16x1xf32> to vector<16x16xf32>
    %54 = arith.mulf %49, %53 : vector<16x16xf32>
    %cst_28 = arith.constant dense<0.000000e+00> : vector<16x8xf32>
    %55 = tpu.matmul %54, %40, %cst_28 {dimension_numbers = #tpu.dot_dimension_numbers<[1], [0], [0], [1], [0, 0, 1, 1], [], []>} : vector<16x16xf32>, vector<16x8xf32>, vector<16x8xf32> -> vector<16x8xf32>
    %56 = vector.extract_strided_slice %35 {offsets = [0, 8], sizes = [16, 8], strides = [1, 1]} : vector<16x32xf32> to vector<16x8xf32>
    %57 = vector.extract_strided_slice %36 {offsets = [0, 8], sizes = [16, 8], strides = [1, 1]} : vector<16x32xf32> to vector<16x8xf32>
    %58 = vector.extract_strided_slice %37 {offsets = [0, 8], sizes = [16, 8], strides = [1, 1]} : vector<16x32xf32> to vector<16x8xf32>
    %cst_29 = arith.constant dense<0.000000e+00> : vector<16x16xf32>
    %59 = tpu.matmul %56, %57, %cst_29 {dimension_numbers = #tpu.dot_dimension_numbers<[1], [1], [0], [0], [0, 0, 1, 0], [], []>} : vector<16x8xf32>, vector<16x8xf32>, vector<16x16xf32> -> vector<16x16xf32>
    %cst_30 = arith.constant 0.353553385 : f32
    %60 = vector.broadcast %cst_30 : f32 to vector<16x16xf32>
    %61 = arith.mulf %59, %60 : vector<16x16xf32>
    %62 = arith.addf %61, %2 : vector<16x16xf32>
    %cst_31 = arith.constant dense<0xFF800000> : vector<16xf32>
    %63 = vector.multi_reduction <maximumf>, %62, %cst_31 [1] : vector<16x16xf32> to vector<16xf32>
    %64 = vector.shape_cast %63 : vector<16xf32> to vector<16x1xf32>
    %65 = vector.broadcast %64 : vector<16x1xf32> to vector<16x16xf32>
    %66 = arith.subf %62, %65 : vector<16x16xf32>
    %67 = math.exp %66 : vector<16x16xf32>
    %cst_32 = arith.constant dense<0.000000e+00> : vector<16xf32>
    %68 = vector.multi_reduction <add>, %67, %cst_32 [1] : vector<16x16xf32> to vector<16xf32>
    %69 = vector.shape_cast %68 : vector<16xf32> to vector<16x1xf32>
    %70 = tpu.reciprocal %69 {approx = true} : vector<16x1xf32> -> vector<16x1xf32>
    %71 = vector.broadcast %70 : vector<16x1xf32> to vector<16x16xf32>
    %72 = arith.mulf %67, %71 : vector<16x16xf32>
    %cst_33 = arith.constant dense<0.000000e+00> : vector<16x8xf32>
    %73 = tpu.matmul %72, %58, %cst_33 {dimension_numbers = #tpu.dot_dimension_numbers<[1], [0], [0], [1], [0, 0, 1, 1], [], []>} : vector<16x16xf32>, vector<16x8xf32>, vector<16x8xf32> -> vector<16x8xf32>
    %74 = vector.extract_strided_slice %35 {offsets = [0, 16], sizes = [16, 8], strides = [1, 1]} : vector<16x32xf32> to vector<16x8xf32>
    %75 = vector.extract_strided_slice %36 {offsets = [0, 16], sizes = [16, 8], strides = [1, 1]} : vector<16x32xf32> to vector<16x8xf32>
    %76 = vector.extract_strided_slice %37 {offsets = [0, 16], sizes = [16, 8], strides = [1, 1]} : vector<16x32xf32> to vector<16x8xf32>
    %cst_34 = arith.constant dense<0.000000e+00> : vector<16x16xf32>
    %77 = tpu.matmul %74, %75, %cst_34 {dimension_numbers = #tpu.dot_dimension_numbers<[1], [1], [0], [0], [0, 0, 1, 0], [], []>} : vector<16x8xf32>, vector<16x8xf32>, vector<16x16xf32> -> vector<16x16xf32>
    %cst_35 = arith.constant 0.353553385 : f32
    %78 = vector.broadcast %cst_35 : f32 to vector<16x16xf32>
    %79 = arith.mulf %77, %78 : vector<16x16xf32>
    %80 = arith.addf %79, %2 : vector<16x16xf32>
    %cst_36 = arith.constant dense<0xFF800000> : vector<16xf32>
    %81 = vector.multi_reduction <maximumf>, %80, %cst_36 [1] : vector<16x16xf32> to vector<16xf32>
    %82 = vector.shape_cast %81 : vector<16xf32> to vector<16x1xf32>
    %83 = vector.broadcast %82 : vector<16x1xf32> to vector<16x16xf32>
    %84 = arith.subf %80, %83 : vector<16x16xf32>
    %85 = math.exp %84 : vector<16x16xf32>
    %cst_37 = arith.constant dense<0.000000e+00> : vector<16xf32>
    %86 = vector.multi_reduction <add>, %85, %cst_37 [1] : vector<16x16xf32> to vector<16xf32>
    %87 = vector.shape_cast %86 : vector<16xf32> to vector<16x1xf32>
    %88 = tpu.reciprocal %87 {approx = true} : vector<16x1xf32> -> vector<16x1xf32>
    %89 = vector.broadcast %88 : vector<16x1xf32> to vector<16x16xf32>
    %90 = arith.mulf %85, %89 : vector<16x16xf32>
    %cst_38 = arith.constant dense<0.000000e+00> : vector<16x8xf32>
    %91 = tpu.matmul %90, %76, %cst_38 {dimension_numbers = #tpu.dot_dimension_numbers<[1], [0], [0], [1], [0, 0, 1, 1], [], []>} : vector<16x16xf32>, vector<16x8xf32>, vector<16x8xf32> -> vector<16x8xf32>
    %92 = vector.extract_strided_slice %35 {offsets = [0, 24], sizes = [16, 8], strides = [1, 1]} : vector<16x32xf32> to vector<16x8xf32>
    %93 = vector.extract_strided_slice %36 {offsets = [0, 24], sizes = [16, 8], strides = [1, 1]} : vector<16x32xf32> to vector<16x8xf32>
    %94 = vector.extract_strided_slice %37 {offsets = [0, 24], sizes = [16, 8], strides = [1, 1]} : vector<16x32xf32> to vector<16x8xf32>
    %cst_39 = arith.constant dense<0.000000e+00> : vector<16x16xf32>
    %95 = tpu.matmul %92, %93, %cst_39 {dimension_numbers = #tpu.dot_dimension_numbers<[1], [1], [0], [0], [0, 0, 1, 0], [], []>} : vector<16x8xf32>, vector<16x8xf32>, vector<16x16xf32> -> vector<16x16xf32>
    %cst_40 = arith.constant 0.353553385 : f32
    %96 = vector.broadcast %cst_40 : f32 to vector<16x16xf32>
    %97 = arith.mulf %95, %96 : vector<16x16xf32>
    %98 = arith.addf %97, %2 : vector<16x16xf32>
    %cst_41 = arith.constant dense<0xFF800000> : vector<16xf32>
    %99 = vector.multi_reduction <maximumf>, %98, %cst_41 [1] : vector<16x16xf32> to vector<16xf32>
    %100 = vector.shape_cast %99 : vector<16xf32> to vector<16x1xf32>
    %101 = vector.broadcast %100 : vector<16x1xf32> to vector<16x16xf32>
    %102 = arith.subf %98, %101 : vector<16x16xf32>
    %103 = math.exp %102 : vector<16x16xf32>
    %cst_42 = arith.constant dense<0.000000e+00> : vector<16xf32>
    %104 = vector.multi_reduction <add>, %103, %cst_42 [1] : vector<16x16xf32> to vector<16xf32>
    %105 = vector.shape_cast %104 : vector<16xf32> to vector<16x1xf32>
    %106 = tpu.reciprocal %105 {approx = true} : vector<16x1xf32> -> vector<16x1xf32>
    %107 = vector.broadcast %106 : vector<16x1xf32> to vector<16x16xf32>
    %108 = arith.mulf %103, %107 : vector<16x16xf32>
    %cst_43 = arith.constant dense<0.000000e+00> : vector<16x8xf32>
    %109 = tpu.matmul %108, %94, %cst_43 {dimension_numbers = #tpu.dot_dimension_numbers<[1], [0], [0], [1], [0, 0, 1, 1], [], []>} : vector<16x16xf32>, vector<16x8xf32>, vector<16x8xf32> -> vector<16x8xf32>
    %110 = tpu.concatenate %55, %73, %91, %109 in 1 : vector<16x8xf32>, vector<16x8xf32>, vector<16x8xf32>, vector<16x8xf32> -> vector<16x32xf32>
    %cst_44 = arith.constant dense<0.000000e+00> : vector<16x32xf32>
    %111 = tpu.matmul %110, %6, %cst_44 {dimension_numbers = #tpu.dot_dimension_numbers<[1], [0], [0], [1], [0, 0, 1, 1], [], []>} : vector<16x32xf32>, vector<32x32xf32>, vector<16x32xf32> -> vector<16x32xf32>
    %112 = vector.broadcast %7 : vector<1x32xf32> to vector<16x32xf32>
    %113 = arith.addf %111, %112 : vector<16x32xf32>
    %114 = arith.addf %0, %113 : vector<16x32xf32>
    %c0_45 = arith.constant 0 : index
    %c0_46 = arith.constant 0 : index
    %115 = vector.load %arg6[%c0_45, %c0_46] : memref<1x32xf32, #tpu.memory_space<vmem>>, vector<1x32xf32>
    %c0_47 = arith.constant 0 : index
    %c0_48 = arith.constant 0 : index
    %116 = vector.load %arg7[%c0_47, %c0_48] : memref<1x32xf32, #tpu.memory_space<vmem>>, vector<1x32xf32>
    %cst_49 = arith.constant dense<0.000000e+00> : vector<16xf32>
    %117 = vector.multi_reduction <add>, %114, %cst_49 [1] : vector<16x32xf32> to vector<16xf32>
    %118 = vector.shape_cast %117 : vector<16xf32> to vector<16x1xf32>
    %cst_50 = arith.constant 3.200000e+01 : f32
    %119 = vector.broadcast %cst_50 : f32 to vector<16x1xf32>
    %120 = arith.divf %118, %119 : vector<16x1xf32>
    %121 = vector.broadcast %120 : vector<16x1xf32> to vector<16x32xf32>
    %122 = arith.subf %114, %121 : vector<16x32xf32>
    %123 = arith.mulf %122, %122 : vector<16x32xf32>
    %cst_51 = arith.constant dense<0.000000e+00> : vector<16xf32>
    %124 = vector.multi_reduction <add>, %123, %cst_51 [1] : vector<16x32xf32> to vector<16xf32>
    %125 = vector.shape_cast %124 : vector<16xf32> to vector<16x1xf32>
    %cst_52 = arith.constant 3.100000e+01 : f32
    %126 = vector.broadcast %cst_52 : f32 to vector<16x1xf32>
    %127 = arith.divf %125, %126 : vector<16x1xf32>
    %128 = math.sqrt %127 : vector<16x1xf32>
    %129 = vector.broadcast %120 : vector<16x1xf32> to vector<16x32xf32>
    %130 = arith.subf %114, %129 : vector<16x32xf32>
    %131 = vector.broadcast %115 : vector<1x32xf32> to vector<16x32xf32>
    %132 = arith.mulf %131, %130 : vector<16x32xf32>
    %cst_53 = arith.constant 9.99999997E-7 : f32
    %133 = vector.broadcast %cst_53 : f32 to vector<16x1xf32>
    %134 = arith.addf %128, %133 : vector<16x1xf32>
    %135 = vector.broadcast %134 : vector<16x1xf32> to vector<16x32xf32>
    %136 = arith.divf %132, %135 : vector<16x32xf32>
    %137 = vector.broadcast %116 : vector<1x32xf32> to vector<16x32xf32>
    %138 = arith.addf %136, %137 : vector<16x32xf32>
    %139 = vector.extract_strided_slice %4 {offsets = [0, 0], sizes = [32, 32], strides = [1, 1]} : vector<32x96xf32> to vector<32x32xf32>
    %cst_54 = arith.constant dense<0.000000e+00> : vector<16x32xf32>
    %140 = tpu.matmul %138, %139, %cst_54 {dimension_numbers = #tpu.dot_dimension_numbers<[1], [0], [0], [1], [0, 0, 1, 1], [], []>} : vector<16x32xf32>, vector<32x32xf32>, vector<16x32xf32> -> vector<16x32xf32>
    %141 = vector.extract_strided_slice %5 {offsets = [0, 0], sizes = [1, 32], strides = [1, 1]} : vector<1x96xf32> to vector<1x32xf32>
    %142 = vector.broadcast %141 : vector<1x32xf32> to vector<16x32xf32>
    %143 = arith.addf %140, %142 : vector<16x32xf32>
    %144 = vector.extract_strided_slice %4 {offsets = [0, 32], sizes = [32, 64], strides = [1, 1]} : vector<32x96xf32> to vector<32x64xf32>
    %cst_55 = arith.constant dense<0.000000e+00> : vector<16x64xf32>
    %145 = tpu.matmul %1, %144, %cst_55 {dimension_numbers = #tpu.dot_dimension_numbers<[1], [0], [0], [1], [0, 0, 1, 1], [], []>} : vector<16x32xf32>, vector<32x64xf32>, vector<16x64xf32> -> vector<16x64xf32>
    %146 = vector.extract_strided_slice %5 {offsets = [0, 32], sizes = [1, 64], strides = [1, 1]} : vector<1x96xf32> to vector<1x64xf32>
    %147 = vector.broadcast %146 : vector<1x64xf32> to vector<16x64xf32>
    %148 = arith.addf %145, %147 : vector<16x64xf32>
    %149 = vector.extract_strided_slice %148 {offsets = [0, 0], sizes = [16, 32], strides = [1, 1]} : vector<16x64xf32> to vector<16x32xf32>
    %150 = vector.extract_strided_slice %148 {offsets = [0, 32], sizes = [16, 32], strides = [1, 1]} : vector<16x64xf32> to vector<16x32xf32>
    %151 = vector.extract_strided_slice %143 {offsets = [0, 0], sizes = [16, 8], strides = [1, 1]} : vector<16x32xf32> to vector<16x8xf32>
    %152 = vector.extract_strided_slice %149 {offsets = [0, 0], sizes = [16, 8], strides = [1, 1]} : vector<16x32xf32> to vector<16x8xf32>
    %153 = vector.extract_strided_slice %150 {offsets = [0, 0], sizes = [16, 8], strides = [1, 1]} : vector<16x32xf32> to vector<16x8xf32>
    %cst_56 = arith.constant dense<0.000000e+00> : vector<16x16xf32>
    %154 = tpu.matmul %151, %152, %cst_56 {dimension_numbers = #tpu.dot_dimension_numbers<[1], [1], [0], [0], [0, 0, 1, 0], [], []>} : vector<16x8xf32>, vector<16x8xf32>, vector<16x16xf32> -> vector<16x16xf32>
    %cst_57 = arith.constant 0.353553385 : f32
    %155 = vector.broadcast %cst_57 : f32 to vector<16x16xf32>
    %156 = arith.mulf %154, %155 : vector<16x16xf32>
    %157 = arith.addf %156, %3 : vector<16x16xf32>
    %cst_58 = arith.constant dense<0xFF800000> : vector<16xf32>
    %158 = vector.multi_reduction <maximumf>, %157, %cst_58 [1] : vector<16x16xf32> to vector<16xf32>
    %159 = vector.shape_cast %158 : vector<16xf32> to vector<16x1xf32>
    %160 = vector.broadcast %159 : vector<16x1xf32> to vector<16x16xf32>
    %161 = arith.subf %157, %160 : vector<16x16xf32>
    %162 = math.exp %161 : vector<16x16xf32>
    %cst_59 = arith.constant dense<0.000000e+00> : vector<16xf32>
    %163 = vector.multi_reduction <add>, %162, %cst_59 [1] : vector<16x16xf32> to vector<16xf32>
    %164 = vector.shape_cast %163 : vector<16xf32> to vector<16x1xf32>
    %165 = tpu.reciprocal %164 {approx = true} : vector<16x1xf32> -> vector<16x1xf32>
    %166 = vector.broadcast %165 : vector<16x1xf32> to vector<16x16xf32>
    %167 = arith.mulf %162, %166 : vector<16x16xf32>
    %cst_60 = arith.constant dense<0.000000e+00> : vector<16x8xf32>
    %168 = tpu.matmul %167, %153, %cst_60 {dimension_numbers = #tpu.dot_dimension_numbers<[1], [0], [0], [1], [0, 0, 1, 1], [], []>} : vector<16x16xf32>, vector<16x8xf32>, vector<16x8xf32> -> vector<16x8xf32>
    %169 = vector.extract_strided_slice %143 {offsets = [0, 8], sizes = [16, 8], strides = [1, 1]} : vector<16x32xf32> to vector<16x8xf32>
    %170 = vector.extract_strided_slice %149 {offsets = [0, 8], sizes = [16, 8], strides = [1, 1]} : vector<16x32xf32> to vector<16x8xf32>
    %171 = vector.extract_strided_slice %150 {offsets = [0, 8], sizes = [16, 8], strides = [1, 1]} : vector<16x32xf32> to vector<16x8xf32>
    %cst_61 = arith.constant dense<0.000000e+00> : vector<16x16xf32>
    %172 = tpu.matmul %169, %170, %cst_61 {dimension_numbers = #tpu.dot_dimension_numbers<[1], [1], [0], [0], [0, 0, 1, 0], [], []>} : vector<16x8xf32>, vector<16x8xf32>, vector<16x16xf32> -> vector<16x16xf32>
    %cst_62 = arith.constant 0.353553385 : f32
    %173 = vector.broadcast %cst_62 : f32 to vector<16x16xf32>
    %174 = arith.mulf %172, %173 : vector<16x16xf32>
    %175 = arith.addf %174, %3 : vector<16x16xf32>
    %cst_63 = arith.constant dense<0xFF800000> : vector<16xf32>
    %176 = vector.multi_reduction <maximumf>, %175, %cst_63 [1] : vector<16x16xf32> to vector<16xf32>
    %177 = vector.shape_cast %176 : vector<16xf32> to vector<16x1xf32>
    %178 = vector.broadcast %177 : vector<16x1xf32> to vector<16x16xf32>
    %179 = arith.subf %175, %178 : vector<16x16xf32>
    %180 = math.exp %179 : vector<16x16xf32>
    %cst_64 = arith.constant dense<0.000000e+00> : vector<16xf32>
    %181 = vector.multi_reduction <add>, %180, %cst_64 [1] : vector<16x16xf32> to vector<16xf32>
    %182 = vector.shape_cast %181 : vector<16xf32> to vector<16x1xf32>
    %183 = tpu.reciprocal %182 {approx = true} : vector<16x1xf32> -> vector<16x1xf32>
    %184 = vector.broadcast %183 : vector<16x1xf32> to vector<16x16xf32>
    %185 = arith.mulf %180, %184 : vector<16x16xf32>
    %cst_65 = arith.constant dense<0.000000e+00> : vector<16x8xf32>
    %186 = tpu.matmul %185, %171, %cst_65 {dimension_numbers = #tpu.dot_dimension_numbers<[1], [0], [0], [1], [0, 0, 1, 1], [], []>} : vector<16x16xf32>, vector<16x8xf32>, vector<16x8xf32> -> vector<16x8xf32>
    %187 = vector.extract_strided_slice %143 {offsets = [0, 16], sizes = [16, 8], strides = [1, 1]} : vector<16x32xf32> to vector<16x8xf32>
    %188 = vector.extract_strided_slice %149 {offsets = [0, 16], sizes = [16, 8], strides = [1, 1]} : vector<16x32xf32> to vector<16x8xf32>
    %189 = vector.extract_strided_slice %150 {offsets = [0, 16], sizes = [16, 8], strides = [1, 1]} : vector<16x32xf32> to vector<16x8xf32>
    %cst_66 = arith.constant dense<0.000000e+00> : vector<16x16xf32>
    %190 = tpu.matmul %187, %188, %cst_66 {dimension_numbers = #tpu.dot_dimension_numbers<[1], [1], [0], [0], [0, 0, 1, 0], [], []>} : vector<16x8xf32>, vector<16x8xf32>, vector<16x16xf32> -> vector<16x16xf32>
    %cst_67 = arith.constant 0.353553385 : f32
    %191 = vector.broadcast %cst_67 : f32 to vector<16x16xf32>
    %192 = arith.mulf %190, %191 : vector<16x16xf32>
    %193 = arith.addf %192, %3 : vector<16x16xf32>
    %cst_68 = arith.constant dense<0xFF800000> : vector<16xf32>
    %194 = vector.multi_reduction <maximumf>, %193, %cst_68 [1] : vector<16x16xf32> to vector<16xf32>
    %195 = vector.shape_cast %194 : vector<16xf32> to vector<16x1xf32>
    %196 = vector.broadcast %195 : vector<16x1xf32> to vector<16x16xf32>
    %197 = arith.subf %193, %196 : vector<16x16xf32>
    %198 = math.exp %197 : vector<16x16xf32>
    %cst_69 = arith.constant dense<0.000000e+00> : vector<16xf32>
    %199 = vector.multi_reduction <add>, %198, %cst_69 [1] : vector<16x16xf32> to vector<16xf32>
    %200 = vector.shape_cast %199 : vector<16xf32> to vector<16x1xf32>
    %201 = tpu.reciprocal %200 {approx = true} : vector<16x1xf32> -> vector<16x1xf32>
    %202 = vector.broadcast %201 : vector<16x1xf32> to vector<16x16xf32>
    %203 = arith.mulf %198, %202 : vector<16x16xf32>
    %cst_70 = arith.constant dense<0.000000e+00> : vector<16x8xf32>
    %204 = tpu.matmul %203, %189, %cst_70 {dimension_numbers = #tpu.dot_dimension_numbers<[1], [0], [0], [1], [0, 0, 1, 1], [], []>} : vector<16x16xf32>, vector<16x8xf32>, vector<16x8xf32> -> vector<16x8xf32>
    %205 = vector.extract_strided_slice %143 {offsets = [0, 24], sizes = [16, 8], strides = [1, 1]} : vector<16x32xf32> to vector<16x8xf32>
    %206 = vector.extract_strided_slice %149 {offsets = [0, 24], sizes = [16, 8], strides = [1, 1]} : vector<16x32xf32> to vector<16x8xf32>
    %207 = vector.extract_strided_slice %150 {offsets = [0, 24], sizes = [16, 8], strides = [1, 1]} : vector<16x32xf32> to vector<16x8xf32>
    %cst_71 = arith.constant dense<0.000000e+00> : vector<16x16xf32>
    %208 = tpu.matmul %205, %206, %cst_71 {dimension_numbers = #tpu.dot_dimension_numbers<[1], [1], [0], [0], [0, 0, 1, 0], [], []>} : vector<16x8xf32>, vector<16x8xf32>, vector<16x16xf32> -> vector<16x16xf32>
    %cst_72 = arith.constant 0.353553385 : f32
    %209 = vector.broadcast %cst_72 : f32 to vector<16x16xf32>
    %210 = arith.mulf %208, %209 : vector<16x16xf32>
    %211 = arith.addf %210, %3 : vector<16x16xf32>
    %cst_73 = arith.constant dense<0xFF800000> : vector<16xf32>
    %212 = vector.multi_reduction <maximumf>, %211, %cst_73 [1] : vector<16x16xf32> to vector<16xf32>
    %213 = vector.shape_cast %212 : vector<16xf32> to vector<16x1xf32>
    %214 = vector.broadcast %213 : vector<16x1xf32> to vector<16x16xf32>
    %215 = arith.subf %211, %214 : vector<16x16xf32>
    %216 = math.exp %215 : vector<16x16xf32>
    %cst_74 = arith.constant dense<0.000000e+00> : vector<16xf32>
    %217 = vector.multi_reduction <add>, %216, %cst_74 [1] : vector<16x16xf32> to vector<16xf32>
    %218 = vector.shape_cast %217 : vector<16xf32> to vector<16x1xf32>
    %219 = tpu.reciprocal %218 {approx = true} : vector<16x1xf32> -> vector<16x1xf32>
    %220 = vector.broadcast %219 : vector<16x1xf32> to vector<16x16xf32>
    %221 = arith.mulf %216, %220 : vector<16x16xf32>
    %cst_75 = arith.constant dense<0.000000e+00> : vector<16x8xf32>
    %222 = tpu.matmul %221, %207, %cst_75 {dimension_numbers = #tpu.dot_dimension_numbers<[1], [0], [0], [1], [0, 0, 1, 1], [], []>} : vector<16x16xf32>, vector<16x8xf32>, vector<16x8xf32> -> vector<16x8xf32>
    %223 = tpu.concatenate %168, %186, %204, %222 in 1 : vector<16x8xf32>, vector<16x8xf32>, vector<16x8xf32>, vector<16x8xf32> -> vector<16x32xf32>
    %cst_76 = arith.constant dense<0.000000e+00> : vector<16x32xf32>
    %224 = tpu.matmul %223, %6, %cst_76 {dimension_numbers = #tpu.dot_dimension_numbers<[1], [0], [0], [1], [0, 0, 1, 1], [], []>} : vector<16x32xf32>, vector<32x32xf32>, vector<16x32xf32> -> vector<16x32xf32>
    %225 = vector.broadcast %7 : vector<1x32xf32> to vector<16x32xf32>
    %226 = arith.addf %224, %225 : vector<16x32xf32>
    %227 = arith.addf %114, %226 : vector<16x32xf32>
    %c0_77 = arith.constant 0 : index
    %c0_78 = arith.constant 0 : index
    %228 = vector.load %arg8[%c0_77, %c0_78] : memref<1x32xf32, #tpu.memory_space<vmem>>, vector<1x32xf32>
    %c0_79 = arith.constant 0 : index
    %c0_80 = arith.constant 0 : index
    %229 = vector.load %arg9[%c0_79, %c0_80] : memref<1x32xf32, #tpu.memory_space<vmem>>, vector<1x32xf32>
    %cst_81 = arith.constant dense<0.000000e+00> : vector<16xf32>
    %230 = vector.multi_reduction <add>, %227, %cst_81 [1] : vector<16x32xf32> to vector<16xf32>
    %231 = vector.shape_cast %230 : vector<16xf32> to vector<16x1xf32>
    %cst_82 = arith.constant 3.200000e+01 : f32
    %232 = vector.broadcast %cst_82 : f32 to vector<16x1xf32>
    %233 = arith.divf %231, %232 : vector<16x1xf32>
    %234 = vector.broadcast %233 : vector<16x1xf32> to vector<16x32xf32>
    %235 = arith.subf %227, %234 : vector<16x32xf32>
    %236 = arith.mulf %235, %235 : vector<16x32xf32>
    %cst_83 = arith.constant dense<0.000000e+00> : vector<16xf32>
    %237 = vector.multi_reduction <add>, %236, %cst_83 [1] : vector<16x32xf32> to vector<16xf32>
    %238 = vector.shape_cast %237 : vector<16xf32> to vector<16x1xf32>
    %cst_84 = arith.constant 3.100000e+01 : f32
    %239 = vector.broadcast %cst_84 : f32 to vector<16x1xf32>
    %240 = arith.divf %238, %239 : vector<16x1xf32>
    %241 = math.sqrt %240 : vector<16x1xf32>
    %242 = vector.broadcast %233 : vector<16x1xf32> to vector<16x32xf32>
    %243 = arith.subf %227, %242 : vector<16x32xf32>
    %244 = vector.broadcast %228 : vector<1x32xf32> to vector<16x32xf32>
    %245 = arith.mulf %244, %243 : vector<16x32xf32>
    %cst_85 = arith.constant 9.99999997E-7 : f32
    %246 = vector.broadcast %cst_85 : f32 to vector<16x1xf32>
    %247 = arith.addf %241, %246 : vector<16x1xf32>
    %248 = vector.broadcast %247 : vector<16x1xf32> to vector<16x32xf32>
    %249 = arith.divf %245, %248 : vector<16x32xf32>
    %250 = vector.broadcast %229 : vector<1x32xf32> to vector<16x32xf32>
    %251 = arith.addf %249, %250 : vector<16x32xf32>
    %c0_86 = arith.constant 0 : index
    %c0_87 = arith.constant 0 : index
    %252 = vector.load %arg14[%c0_86, %c0_87] : memref<32x64xf32, #tpu.memory_space<vmem>>, vector<32x64xf32>
    %cst_88 = arith.constant dense<0.000000e+00> : vector<16x64xf32>
    %253 = tpu.matmul %251, %252, %cst_88 {dimension_numbers = #tpu.dot_dimension_numbers<[1], [0], [0], [1], [0, 0, 1, 1], [], []>} : vector<16x32xf32>, vector<32x64xf32>, vector<16x64xf32> -> vector<16x64xf32>
    %c0_89 = arith.constant 0 : index
    %c0_90 = arith.constant 0 : index
    %254 = vector.load %arg15[%c0_89, %c0_90] : memref<1x64xf32, #tpu.memory_space<vmem>>, vector<1x64xf32>
    %255 = vector.broadcast %254 : vector<1x64xf32> to vector<16x64xf32>
    %256 = arith.addf %253, %255 : vector<16x64xf32>
    %cst_91 = arith.constant 0.000000e+00 : f32
    %257 = vector.broadcast %cst_91 : f32 to vector<16x64xf32>
    %258 = arith.maximumf %256, %257 : vector<16x64xf32>
    %c0_92 = arith.constant 0 : index
    %c0_93 = arith.constant 0 : index
    %259 = vector.load %arg16[%c0_92, %c0_93] : memref<64x32xf32, #tpu.memory_space<vmem>>, vector<64x32xf32>
    %cst_94 = arith.constant dense<0.000000e+00> : vector<16x32xf32>
    %260 = tpu.matmul %258, %259, %cst_94 {dimension_numbers = #tpu.dot_dimension_numbers<[1], [0], [0], [1], [0, 0, 1, 1], [], []>} : vector<16x64xf32>, vector<64x32xf32>, vector<16x32xf32> -> vector<16x32xf32>
    %c0_95 = arith.constant 0 : index
    %c0_96 = arith.constant 0 : index
    %261 = vector.load %arg17[%c0_95, %c0_96] : memref<1x32xf32, #tpu.memory_space<vmem>>, vector<1x32xf32>
    %262 = vector.broadcast %261 : vector<1x32xf32> to vector<16x32xf32>
    %263 = arith.addf %260, %262 : vector<16x32xf32>
    %264 = arith.addf %227, %263 : vector<16x32xf32>
    %c0_97 = arith.constant 0 : index
    %c0_98 = arith.constant 0 : index
    %265 = vector.load %arg18[%c0_97, %c0_98] : memref<16x32xf32, #tpu.memory_space<vmem>>, vector<16x32xf32>
    tpu.vector_store %arg18[%c0_97, %c0_98], %264 {strides = array<i32>} : memref<16x32xf32, #tpu.memory_space<vmem>>, vector<16x32xf32>,
    return
  }
}

</mosaic_0001>

<bundles_post_ra>
// kernel: tpu_custom_call.1
= control target key start
LH: loop header
LB: loop body
LE: loop exit
PB: predicated region body
PF: predicated region fallthrough
CT: control target
= control target key end

     0   :  { %s3873_s0 = inlined_call_operand.hbm [shape: f32[16,32], index: 0, kind: input, shape index: {}]   ;;  %s3874_s1 = inlined_call_operand.hbm [shape: f32[16,32], index: 1, kind: input, shape index: {}]   ;;  %s3875_s2 = inlined_call_operand.hbm [shape: f32[16,16], index: 2, kind: input, shape index: {}]   ;;  %s3876_s3 = inlined_call_operand.hbm [shape: f32[16,16], index: 3, kind: input, shape index: {}]   ;;  %s3877_s4 = inlined_call_operand.vmem [shape: f32[1,32], index: 4, kind: input, shape index: {}]   ;;  %s3878_s5 = inlined_call_operand.vmem [shape: f32[1,32], index: 5, kind: input, shape index: {}]   ;;  %s3879_s6 = inlined_call_operand.vmem [shape: f32[1,32], index: 6, kind: input, shape index: {}]   ;;  %s3880_s7 = inlined_call_operand.vmem [shape: f32[1,32], index: 7, kind: input, shape index: {}]   ;;  %s3881_s8 = inlined_call_operand.vmem [shape: f32[1,32], index: 8, kind: input, shape index: {}]   ;;  %s3882_s9 = inlined_call_operand.vmem [shape: f32[1,32], index: 9, kind: input, shape index: {}]   ;;  %s3883_s10 = inlined_call_operand.vmem [shape: f32[32,96], index: 10, kind: input, shape index: {}]   ;;  %s3884_s11 = inlined_call_operand.vmem [shape: f32[1,96], index: 11, kind: input, shape index: {}]   ;;  %s3885_s12 = inlined_call_operand.vmem [shape: f32[32,32], index: 12, kind: input, shape index: {}]   ;;  %s3886_s13 = inlined_call_operand.vmem [shape: f32[1,32], index: 13, kind: input, shape index: {}]   ;;  %s3887_s14 = inlined_call_operand.vmem [shape: f32[32,64], index: 14, kind: input, shape index: {}]   ;;  %s3888_s15 = inlined_call_operand.vmem [shape: f32[1,64], index: 15, kind: input, shape index: {}]   ;;  %s3889_s16 = inlined_call_operand.vmem [shape: f32[64,32], index: 16, kind: input, shape index: {}]   ;;  %s3890_s17 = inlined_call_operand.vmem [shape: f32[1,32], index: 17, kind: input, shape index: {}]   ;;  %s3891_s18 = inlined_call_operand.hbm [shape: f32[16,32], index: 18, kind: output, shape index: {}]  }
   0x1   :  { %3892 = sst [smem:[#allocation15_spill]] %s3873_s0 }
   0x2   :  { %3893 = sst [smem:[#allocation16_spill]] %s3874_s1 }
   0x3   :  { %3894 = sst [smem:[#allocation17_spill]] %s3875_s2 }
   0x4   :  { %23 = vsyncpa [#allocation3], 0 }
   0x5   :  { %24 = vsyncpa [#allocation6], 0 }
   0x6   :  { %25 = vsyncpa [#allocation9], 0 }
   0x7   :  { %26 = vsyncpa [#allocation4], 0  ;;  %s3248_s27 = smov [#allocation5]   ;;  %s3249_s29 = smov [#allocation2]  }
   0x8   :  { %s44_s28 = sshll.u32 %s3248_s27, 4  ;;  %s32_s30 = sshll.u32 %s3249_s29, 4  ;;  %s45_s28 = int_to_ptr.vmem [resolvable:$true] %s44_s28  ;;  %s33_s30 = int_to_ptr.vmem [resolvable:$true] %s32_s30 }
   0x9   :  { %s3148_s0 = scalar_lea.vmem %s45_s28, 256  ;;  %p3153_p1 = scmp.lt.s32.totalorder %s45_s28, %s45_s28 }
   0xa   :  { %p3149_p0 = scmp.ne.s32.totalorder %s45_s28, %s3148_s0  ;;  %p3154_p2 = scmp.lt.s32.totalorder %s3148_s0, %s3148_s0 }
   0xc   :  { %p3155_p3 = por %p3154_p2, %p3153_p1 }
   0xe   :  { %p3156_p4 = pnand %p3155_p3, %p3149_p0 }
  0x10   :  { %3159 = shalt.err (!%p3156_p4)
}
  0x11   :  { %s3250_s19 = smov 128   ;;  %s3251_s1 = smov 8  }
  0x12   :  { %s3895_s22 = sld [smem:[#allocation16_spill]]  ;;  %s3168_s2 = scalar_lea.vmem %s33_s30, 256 }
  0x13   :  { %p3169_p5 = scmp.ne.s32.totalorder %s33_s30, %s3168_s2  ;;  %p3173_p6 = scmp.lt.s32.totalorder %s33_s30, %s33_s30 }
  0x14   :  { %p3174_p7 = scmp.lt.s32.totalorder %s3168_s2, %s3168_s2 }
  0x16   :  { %p3175_p8 = por %p3174_p7, %p3173_p6 }
  0x18   :  { %50 = dma.hbm_to_vmem [thread:$0]  %s3895_s22, 256, %s45_s28, [#allocation6], %s3250_s19, %s3250_s19, %s3251_s1  }
  0x19   :  { %p3176_p9 = pnand %p3175_p8, %p3169_p5 }
  0x1b   :  { %3179 = shalt.err (!%p3176_p9)
}
  0x1c   :  { %s3896_s25 = sld [smem:[#allocation15_spill]]  ;;  %s3252_s26 = smov [#allocation7]  }
  0x1d   :  { %s56_s27 = sshll.u32 %s3252_s26, 4  ;;  %s3253_s29 = smov [#allocation8]   ;;  %s57_s27 = int_to_ptr.vmem [resolvable:$true] %s56_s27 }
  0x1e   :  { %s68_s0 = sshll.u32 %s3253_s29, 4  ;;  %s3188_s28 = scalar_lea.vmem %s57_s27, 256  ;;  %s69_s0 = int_to_ptr.vmem [resolvable:$true] %s68_s0 }
  0x1f   :  { %p3189_p10 = scmp.ne.s32.totalorder %s57_s27, %s3188_s28  ;;  %p3193_p11 = scmp.lt.s32.totalorder %s57_s27, %s57_s27 }
  0x20   :  { %p3194_p12 = scmp.lt.s32.totalorder %s3188_s28, %s3188_s28 }
  0x22   :  { %38 = dma.hbm_to_vmem [thread:$0]  %s3896_s25, 256, %s33_s30, [#allocation3], %s3250_s19, %s3250_s19, %s3251_s1  }
  0x23   :  { %p3195_p13 = por %p3194_p12, %p3193_p11 }
  0x25   :  { %p3196_p0 = pnand %p3195_p13, %p3189_p10 }
  0x27   :  { %3199 = shalt.err (!%p3196_p0)
}
  0x28   :  { %s3897_s22 = sld [smem:[#allocation17_spill]]  ;;  %s3208_s30 = scalar_lea.vmem %s69_s0, 256 }
  0x29   :  { %p3209_p1 = scmp.ne.s32.totalorder %s69_s0, %s3208_s30  ;;  %p3213_p2 = scmp.lt.s32.totalorder %s69_s0, %s69_s0 }
  0x2a   :  { %p3214_p3 = scmp.lt.s32.totalorder %s3208_s30, %s3208_s30 }
  0x2c   :  { %p3215_p4 = por %p3214_p3, %p3213_p2 }
  0x2e   :  { %62 = dma.hbm_to_vmem [thread:$0]  %s3897_s22, 256, %s57_s27, [#allocation6], %s3250_s19, %s3250_s19, %s3251_s1  }
  0x2f   :  { %p3216_p5 = pnand %p3215_p4, %p3209_p1 }
  0x31   :  { %3219 = shalt.err (!%p3216_p5)
}
  0x32   :  { %74 = dma.hbm_to_vmem [thread:$0]  %s3876_s3, 256, %s69_s0, [#allocation9], %s3250_s19, %s3250_s19, %s3251_s1  }
  0x33   :  { %3240 = dma.done.wait [#allocation3], 256  }
  0x34   :  { %3241 = vsyncadd [#allocation3], 4294967040 }
  0x35   :  { %3242 = dma.done.wait [#allocation6], 512  }
  0x36   :  { %3243 = vsyncadd [#allocation6], 4294966784 }
  0x37   :  { %3244 = dma.done.wait [#allocation9], 256  }
  0x38   :  { %3245 = vsyncadd [#allocation9], 4294967040  ;;  %vm135_vm0 = vcmask 261120   ;;  %v3387_v0 = vld [vmem:[#allocation2] sm:$0xff]  ;;  %v3389_v1 = vld [vmem:[#allocation2 + $0x8] sm:$0xff]  ;;  %vm287_vm5 = vcmask 64512  }
  0x39   :  { %v136_v2 = vsel %vm135_vm0, %v3387_v0, 0.0  ;;  %v139_v3 = vsel %vm135_vm0, %v3389_v1, 0.0  ;;  %v3402_v14 = vld [vmem:[%s3883_s10 + $0x18] sm:$0xff]  ;;  %v3407_v15 = vld [vmem:[%s3883_s10 + $0x10] sm:$0xff]  ;;  %v3414_v16 = vld [vmem:[%s3883_s10 + $0x8] sm:$0xff]  ;;  %vm375_vm6 = vcmask 130048  }
  0x3a   :  { %137 = vadd.xlane.f32.xlu0 %v136_v2  ;;  %2835 = vmatprep.subr.mxu1 %v3402_v14  ;;  %v3423_v17 = vld [vmem:[%s3883_s10] sm:$0xff]  ;;  %v3472_v56 = vld [vmem:[#allocation7 + $0x8] sm:$0xff]  ;;  %s3257_s23 = smov 64   ;;  %s3258_s3 = smov 56   ;;  %vm1125_vm7 = vcmask 195584  }
  0x3b   :  { %2836 = vmatpush3.msra.mxu1 %v3402_v14  ;;  %v2653_v34 = vld [vmem:[%s3877_s4] ss:$0 sm:$0xff]  ;;  %s3254_s4 = smov 96   ;;  %s3259_s24 = smov 80  }
  0x3c   :  { %2837 = vmatprep.subr.mxu1 %v3407_v15  ;;  %v2654_v37 = vld [vmem:[%s3878_s5] ss:$0 sm:$0xff]  ;;  %s3255_s5 = smov 120   ;;  %s3260_s25 = smov 112  }
  0x3d   :  { %2838 = vmatpush3.msra.mxu1 %v3407_v15  ;;  %v3438_v44 = vld [vmem:[%s3884_s11] ss:$0 sm:$0xff]  ;;  %s3256_s11 = smov 88   ;;  %s3261_s26 = smov 48  }
  0x3e   :  { %140 = vadd.xlane.f32.xlu0 %v139_v3  ;;  %2839 = vmatprep.subr.mxu1 %v3414_v16  ;;  %v3474_v59 = vld [vmem:[#allocation7] sm:$0xff]  ;;  %s3262_s27 = smov 72   ;;  %s3263_s29 = smov 104  }
  0x3f   :  { %2840 = vmatpush3.msra.mxu1 %v3414_v16  ;;  %s3264_s0 = smov 40   ;;  %s3265_s28 = smov 16  }
  0x40   :  { %2841 = vmatprep.subr.mxu1 %v3423_v17 }
  0x41   :  { %2842 = vmatpush3.msra.mxu1 %v3423_v17 }
  0xc3   :  { %v138_v4 = vpop.xlane.xlu0 %137 }
  0xc4   :  { %v143_v5 = vmul.f32 0.03125, %v138_v4 }
  0xc6   :  { %v145_v6 = vsub.f32 %v3387_v0, %v143_v5 }
  0xc7   :  { %v141_v7 = vpop.xlane.xlu0 %140 }
  0xc8   :  { %v144_v8 = vmul.f32 0.03125, %v141_v7  ;;  %v147_v9 = vmul.f32 %v145_v6, %v145_v6  ;;  %v178_v35 = vmul.f32 %v2653_v34, %v145_v6 }
  0xca   :  { %v146_v10 = vsub.f32 %v3389_v1, %v144_v8  ;;  %v149_v11 = vsel %vm135_vm0, %v147_v9, 0.0 }
  0xcb   :  { %150 = vadd.xlane.f32.xlu1 %v149_v11 }
  0xcc   :  { %v148_v12 = vmul.f32 %v146_v10, %v146_v10  ;;  %v179_v39 = vmul.f32 %v2653_v34, %v146_v10 }
  0xce   :  { %v152_v13 = vsel %vm135_vm0, %v148_v12, 0.0 }
  0xcf   :  { %153 = vadd.xlane.f32.xlu1 %v152_v13 }
 0x154   :  { %v151_v18 = vpop.xlane.xlu1 %150 }
 0x155   :  { %v156_v19 = vmul.f32 0.032258064, %v151_v18 }
 0x157   :  { %3052 = vrsqrt.f32 %v156_v19  ;;  %vm160_vm1 = vcmp.eq.f32.partialorder %v156_v19, inf  ;;  %v163_v24 = vand.u32 2147483648, %v156_v19  ;;  %vm162_vm2 = vcmp.eq.f32.partialorder %v156_v19, 0.0 }
 0x158   :  { %v154_v20 = vpop.xlane.xlu1 %153 }
 0x159   :  { %v157_v21 = vmul.f32 0.032258064, %v154_v20 }
 0x15b   :  { %3054 = vrsqrt.f32 %v157_v21  ;;  %vm167_vm3 = vcmp.eq.f32.partialorder %v157_v21, inf  ;;  %v170_v30 = vand.u32 2147483648, %v157_v21  ;;  %vm169_vm4 = vcmp.eq.f32.partialorder %v157_v21, 0.0 }
 0x164   :  { %v3053_v22 = vpop.eup %3052 }
 0x165   :  { %v159_v23 = vmul.f32 %v3053_v22, %v156_v19 }
 0x167   :  { %v161_v25 = vsel %vm160_vm1, %v156_v19, %v159_v23  ;;  %vm2548_vm1 = vcmask 523264  }
 0x168   :  { %v3055_v26 = vpop.eup %3054  ;;  %v164_v27 = vsel %vm162_vm2, %v163_v24, %v161_v25 }
 0x169   :  { %v166_v28 = vmul.f32 %v3055_v26, %v157_v21  ;;  %v180_v29 = vadd.f32 1e-06, %v164_v27 }
 0x16b   :  { %v168_v31 = vsel %vm167_vm3, %v157_v21, %v166_v28  ;;  %3056 = vrcp.f32 %v180_v29 }
 0x16c   :  { %v171_v32 = vsel %vm169_vm4, %v170_v30, %v168_v31 }
 0x16d   :  { %v181_v33 = vadd.f32 1e-06, %v171_v32 }
 0x16f   :  { %3058 = vrcp.f32 %v181_v33 }
 0x178   :  { %v3057_v36 = vpop.eup %3056 }
 0x179   :  { %v183_v38 = vmul.f32 %v3057_v36, %v178_v35 }
 0x17b   :  { %v192_v40 = vadd.f32 %v2654_v37, %v183_v38 }
 0x17c   :  { %v3059_v41 = vpop.eup %3058 }
 0x17d   :  { %v185_v42 = vmul.f32 %v3059_v41, %v179_v39  ;;  %2843 = vmatprep.mubr.msk.f32.mxu1 %vm135_vm0, %v192_v40 }
 0x17f   :  { %v193_v43 = vadd.f32 %v2654_v37, %v185_v42 }
 0x181   :  { %2844 = vmatmul.mubr.msk.f32.vlgmr.msra.gmra.mxu1 %vm135_vm0, %v193_v43 }
 0x241   :  { %v2845_v45 = vpop.f32.mrf.mxu1 }
 0x242   :  { %v3441_v46 = vadd.f32 %v2845_v45, %v3438_v44 }
 0x243   :  { %v272_v47 = vpop.f32.mrf.mxu1 }
 0x244   :  { %v3444_v48 = vadd.f32 %v3438_v44, %v272_v47  ;;  %285 = vrot.lane.b32.xlu0 %v3441_v46, %s3254_s4 }
 0x246   :  { %283 = vrot.lane.b32.xlu1 %v3444_v48, %s3254_s4  ;;  %2850 = vmatprep.mubr.msk.f32.mxu1 %vm287_vm5, %v3444_v48 }
 0x248   :  { %485 = vrot.lane.b32.xlu0 %v3444_v48, %s3255_s5 }
 0x24a   :  { %491 = vrot.lane.b32.xlu1 %v3441_v46, %s3256_s11 }
 0x24e   :  { %489 = vrot.lane.b32.xlu1 %v3444_v48, %s3256_s11 }
 0x252   :  { %487 = vrot.lane.b32.xlu1 %v3441_v46, %s3255_s5 }
 0x2b6   :  { %v286_v49 = vpop.permute.xlu0 %285 }
 0x2b7   :  { %2846 = vmatprep.subr.msk.mxu1 %vm287_vm5, %v286_v49 }
 0x2b8   :  { %2847 = vmatpush3.xpose.msk.msra.mxu1 %vm287_vm5, %v286_v49  ;;  %v284_v50 = vpop.permute.xlu1 %283 }
 0x2b9   :  { %2848 = vmatprep.subr.msk.mxu1 %vm287_vm5, %v284_v50 }
 0x2ba   :  { %v486_v52 = vpop.permute.xlu0 %485 }
 0x2bc   :  { %2849 = vmatpush3.xpose.msk.msra.mxu1 %vm287_vm5, %v284_v50  ;;  %v492_v51 = vpop.permute.xlu1 %491 }
 0x2bd   :  { %2860 = vmatprep.subr.msk.mxu1 %vm287_vm5, %v492_v51 }
 0x2bf   :  { %2851 = vmatmul.mubr.msk.f32.vlgmr.msra.gmra.mxu1 %vm287_vm5, %v3441_v46 }
 0x2c0   :  { %v490_v53 = vpop.permute.xlu1 %489  ;;  %2861 = vmatpush3.xpose.msk.msra.mxu1 %vm287_vm5, %v492_v51  ;;  %2864 = vmatprep.mubr.msk.f32.mxu1 %vm287_vm5, %v486_v52 }
 0x2c1   :  { %2862 = vmatprep.subr.msk.mxu1 %vm287_vm5, %v490_v53 }
 0x2c4   :  { %2863 = vmatpush3.xpose.msk.msra.mxu1 %vm287_vm5, %v490_v53  ;;  %v488_v54 = vpop.permute.xlu1 %487 }
 0x2c7   :  { %2865 = vmatmul.mubr.msk.f32.vlgmr.msra.gmra.mxu1 %vm287_vm5, %v488_v54 }
 0x37f   :  { %v2852_v55 = vpop.f32.mrf.mxu1 }
 0x380   :  { %v372_v57 = vmul.f32 0.35355338, %v2852_v55 }
 0x381   :  { %v362_v58 = vpop.f32.mrf.mxu1 }
 0x382   :  { %v371_v60 = vmul.f32 0.35355338, %v362_v58  ;;  %v374_v61 = vadd.f32 %v372_v57, %v3472_v56 }
 0x384   :  { %v379_v62 = vsel %vm375_vm6, %v374_v61, -inf  ;;  %v373_v63 = vadd.f32 %v371_v60, %v3474_v59 }
 0x385   :  { %380 = vmax.xlane.f32.xlu1 %v379_v62 }
 0x386   :  { %v376_v2 = vsel %vm375_vm6, %v373_v63, -inf }
 0x387   :  { %v2866_v3 = vpop.f32.mrf.mxu1  ;;  %377 = vmax.xlane.f32.xlu0 %v376_v2 }
 0x388   :  { %v577_v5 = vmul.f32 0.35355338, %v2866_v3 }
 0x389   :  { %v567_v4 = vpop.f32.mrf.mxu1 }
 0x38a   :  { %v576_v6 = vmul.f32 0.35355338, %v567_v4  ;;  %v579_v9 = vadd.f32 %v577_v5, %v3472_v56 }
 0x38c   :  { %v578_v7 = vadd.f32 %v576_v6, %v3474_v59  ;;  %v583_v10 = vsel %vm375_vm6, %v579_v9, -inf }
 0x38e   :  { %v580_v8 = vsel %vm375_vm6, %v578_v7, -inf }
 0x38f   :  { %581 = vmax.xlane.f32.xlu0 %v580_v8 }
 0x393   :  { %584 = vmax.xlane.f32.xlu0 %v583_v10 }
 0x396   :  { %398 = vrot.lane.b32.xlu1 %v3444_v48, %s3257_s23 }
 0x39a   :  { %604 = vrot.lane.b32.xlu1 %v3441_v46, %s3258_s3 }
 0x39e   :  { %602 = vrot.lane.b32.xlu1 %v3444_v48, %s3258_s3 }
 0x3a9   :  { %400 = vrot.lane.b32.xlu0 %v3441_v46, %s3257_s23 }
 0x40e   :  { %v381_v11 = vpop.xlane.xlu1 %380 }
 0x40f   :  { %v383_v12 = vsub.f32 %v374_v61, %v381_v11 }
 0x410   :  { %v378_v13 = vpop.xlane.xlu0 %377 }
 0x411   :  { %v386_v18 = vmul.f32 1.442695, %v383_v12  ;;  %v382_v19 = vsub.f32 %v373_v63, %v378_v13 }
 0x412   :  { %v399_v26 = vpop.permute.xlu1 %398 }
 0x413   :  { %3060 = vpow2.f32 %v386_v18  ;;  %v384_v20 = vmul.f32 1.442695, %v382_v19 }
 0x415   :  { %3062 = vpow2.f32 %v384_v20 }
 0x416   :  { %v605_v33 = vpop.permute.xlu1 %604 }
 0x418   :  { %v582_v21 = vpop.xlane.xlu0 %581 }
 0x419   :  { %v586_v22 = vsub.f32 %v578_v7, %v582_v21 }
 0x41a   :  { %v603_v38 = vpop.permute.xlu1 %602 }
 0x41b   :  { %v588_v23 = vmul.f32 1.442695, %v586_v22 }
 0x41c   :  { %v585_v24 = vpop.xlane.xlu0 %584 }
 0x41d   :  { %3064 = vpow2.f32 %v588_v23  ;;  %v587_v25 = vsub.f32 %v579_v9, %v585_v24 }
 0x41f   :  { %v590_v27 = vmul.f32 1.442695, %v587_v25 }
 0x420   :  { %v3061_v28 = vpop.eup %3060  ;;  %v401_v29 = vpop.permute.xlu0 %400 }
 0x421   :  { %3066 = vpow2.f32 %v590_v27  ;;  %2853 = vmatprep.subr.mxu0 %v401_v29  ;;  %v391_v30 = vsel %vm375_vm6, %v3061_v28, 0.0 }
 0x422   :  { %v3063_v31 = vpop.eup %3062  ;;  %392 = vadd.xlane.f32.xlu1 %v391_v30  ;;  %2854 = vmatpush3.msra.mxu0 %v401_v29 }
 0x423   :  { %2855 = vmatprep.subr.mxu0 %v399_v26  ;;  %v388_v32 = vsel %vm375_vm6, %v3063_v31, 0.0 }
 0x424   :  { %389 = vadd.xlane.f32.xlu0 %v388_v32  ;;  %2856 = vmatpush3.msra.mxu0 %v399_v26 }
 0x425   :  { %2867 = vmatprep.subr.mxu0 %v605_v33 }
 0x42a   :  { %v3065_v34 = vpop.eup %3064 }
 0x42b   :  { %v592_v35 = vsel %vm375_vm6, %v3065_v34, 0.0 }
 0x42c   :  { %593 = vadd.xlane.f32.xlu0 %v592_v35 }
 0x42e   :  { %v3067_v36 = vpop.eup %3066 }
 0x42f   :  { %v595_v37 = vsel %vm375_vm6, %v3067_v36, 0.0 }
 0x430   :  { %596 = vadd.xlane.f32.xlu1 %v595_v37 }
 0x441   :  { %693 = vrot.lane.b32.xlu1 %v3444_v48, %s3259_s24 }
 0x442   :  { %695 = vrot.lane.b32.xlu0 %v3441_v46, %s3259_s24 }
 0x445   :  { %691 = vrot.lane.b32.xlu1 %v3441_v46, %s3260_s25 }
 0x446   :  { %689 = vrot.lane.b32.xlu0 %v3444_v48, %s3260_s25 }
 0x4ab   :  { %v393_v39 = vpop.xlane.xlu1 %392 }
 0x4ac   :  { %3068 = vrcp.f32 %v393_v39 }
 0x4ad   :  { %v390_v40 = vpop.xlane.xlu0 %389 }
 0x4ae   :  { %3070 = vrcp.f32 %v390_v40 }
 0x4b5   :  { %v594_v41 = vpop.xlane.xlu0 %593 }
 0x4b6   :  { %3072 = vrcp.f32 %v594_v41 }
 0x4b9   :  { %v597_v42 = vpop.xlane.xlu1 %596  ;;  %v3069_v43 = vpop.eup %3068 }
 0x4ba   :  { %3074 = vrcp.f32 %v597_v42  ;;  %v397_v49 = vmul.f32 %v3069_v43, %v3061_v28  ;;  %v696_v50 = vpop.permute.xlu0 %695 }
 0x4bb   :  { %v3071_v45 = vpop.eup %3070 }
 0x4bc   :  { %v396_v47 = vmul.f32 %v3071_v45, %v3063_v31 }
 0x4bd   :  { %v694_v57 = vpop.permute.xlu1 %693 }
 0x4be   :  { %2857 = vmatprep.mubr.msk.f32.mxu0 %vm375_vm6, %v396_v47  ;;  %v690_v55 = vpop.permute.xlu0 %689 }
 0x4bf   :  { %2858 = vmatmul.mubr.msk.f32.vlgmr.msra.gmra.mxu0 %vm375_vm6, %v397_v49 }
 0x4c0   :  { %2868 = vmatpush3.msra.mxu0 %v605_v33 }
 0x4c1   :  { %2869 = vmatprep.subr.mxu0 %v603_v38  ;;  %v692_v58 = vpop.permute.xlu1 %691 }
 0x4c2   :  { %2870 = vmatpush3.msra.mxu0 %v603_v38 }
 0x4c3   :  { %v3073_v51 = vpop.eup %3072  ;;  %2874 = vmatprep.subr.msk.mxu0 %vm287_vm5, %v696_v50 }
 0x4c4   :  { %v600_v52 = vmul.f32 %v3073_v51, %v3065_v34 }
 0x4c6   :  { %2871 = vmatprep.mubr.msk.f32.mxu0 %vm375_vm6, %v600_v52 }
 0x4c7   :  { %v3075_v53 = vpop.eup %3074 }
 0x4c8   :  { %v601_v54 = vmul.f32 %v3075_v53, %v3067_v36 }
 0x4ca   :  { %2872 = vmatmul.mubr.msk.f32.vlgmr.msra.gmra.mxu0 %vm375_vm6, %v601_v54 }
 0x4cb   :  { %2875 = vmatpush3.xpose.msk.msra.mxu0 %vm287_vm5, %v696_v50  ;;  %2878 = vmatprep.mubr.msk.f32.mxu0 %vm287_vm5, %v690_v55 }
 0x4cc   :  { %2876 = vmatprep.subr.msk.mxu0 %vm287_vm5, %v694_v57 }
 0x4cf   :  { %2877 = vmatpush3.xpose.msk.msra.mxu0 %vm287_vm5, %v694_v57 }
 0x4d2   :  { %2879 = vmatmul.mubr.msk.f32.vlgmr.msra.gmra.mxu0 %vm287_vm5, %v692_v58 }
 0x57f   :  { %v3510_v60 = vpop.f32.mrf.mxu0 }
 0x581   :  { %v3512_v61 = vpop.f32.mrf.mxu0 }
 0x58a   :  { %v3514_v62 = vpop.f32.mrf.mxu0 }
 0x58c   :  { %v3516_v63 = vpop.f32.mrf.mxu0 }
 0x592   :  { %v2880_v2 = vpop.f32.mrf.mxu0 }
 0x593   :  { %v781_v3 = vmul.f32 0.35355338, %v2880_v2 }
 0x594   :  { %v771_v4 = vpop.f32.mrf.mxu0 }
 0x595   :  { %v780_v5 = vmul.f32 0.35355338, %v771_v4  ;;  %v783_v6 = vadd.f32 %v781_v3, %v3472_v56 }
 0x597   :  { %v787_v7 = vsel %vm375_vm6, %v783_v6, -inf  ;;  %v782_v8 = vadd.f32 %v780_v5, %v3474_v59 }
 0x598   :  { %788 = vmax.xlane.f32.xlu1 %v787_v7  ;;  %v3583_v7 = vld [vmem:[%s3885_s12 + $0x8] sm:$0xff] }
 0x599   :  { %v784_v9 = vsel %vm375_vm6, %v782_v8, -inf }
 0x59a   :  { %785 = vmax.xlane.f32.xlu0 %v784_v9 }
 0x5a9   :  { %806 = vrot.lane.b32.xlu1 %v3444_v48, %s3261_s26 }
 0x5ad   :  { %899 = vrot.lane.b32.xlu1 %v3441_v46, %s3262_s27 }
 0x5b1   :  { %897 = vrot.lane.b32.xlu1 %v3444_v48, %s3262_s27 }
 0x5b5   :  { %895 = vrot.lane.b32.xlu1 %v3441_v46, %s3263_s29 }
 0x621   :  { %v789_v10 = vpop.xlane.xlu1 %788 }
 0x622   :  { %v791_v11 = vsub.f32 %v783_v6, %v789_v10  ;;  %v3574_v6 = vld [vmem:[%s3885_s12 + $0x10] sm:$0xff] }
 0x623   :  { %v786_v12 = vpop.xlane.xlu0 %785 }
 0x624   :  { %v794_v13 = vmul.f32 1.442695, %v791_v11  ;;  %v790_v18 = vsub.f32 %v782_v8, %v786_v12  ;;  %v3590_v8 = vld [vmem:[%s3885_s12] sm:$0xff] }
 0x625   :  { %v807_v26 = vpop.permute.xlu1 %806 }
 0x626   :  { %3076 = vpow2.f32 %v794_v13  ;;  %v792_v19 = vmul.f32 1.442695, %v790_v18 }
 0x628   :  { %3078 = vpow2.f32 %v792_v19 }
 0x629   :  { %v900_v28 = vpop.permute.xlu1 %899 }
 0x62d   :  { %v898_v34 = vpop.permute.xlu1 %897 }
 0x631   :  { %v896_v35 = vpop.permute.xlu1 %895 }
 0x633   :  { %v3077_v20 = vpop.eup %3076 }
 0x634   :  { %v799_v21 = vsel %vm375_vm6, %v3077_v20, 0.0 }
 0x635   :  { %v3079_v22 = vpop.eup %3078  ;;  %800 = vadd.xlane.f32.xlu0 %v799_v21 }
 0x636   :  { %v796_v23 = vsel %vm375_vm6, %v3079_v22, 0.0 }
 0x639   :  { %797 = vadd.xlane.f32.xlu0 %v796_v23 }
 0x64f   :  { %808 = vrot.lane.b32.xlu0 %v3441_v46, %s3261_s26  ;;  %s3266_s26 = smov 24  }
 0x653   :  { %893 = vrot.lane.b32.xlu0 %v3444_v48, %s3263_s29 }
 0x6be   :  { %v801_v24 = vpop.xlane.xlu0 %800 }
 0x6bf   :  { %3080 = vrcp.f32 %v801_v24 }
 0x6c2   :  { %v798_v25 = vpop.xlane.xlu0 %797 }
 0x6c3   :  { %3082 = vrcp.f32 %v798_v25 }
 0x6c6   :  { %v809_v27 = vpop.permute.xlu0 %808 }
 0x6c7   :  { %2881 = vmatprep.subr.mxu1 %v809_v27 }
 0x6c8   :  { %2882 = vmatpush3.msra.mxu1 %v809_v27 }
 0x6c9   :  { %2883 = vmatprep.subr.mxu1 %v807_v26 }
 0x6ca   :  { %2884 = vmatpush3.msra.mxu1 %v807_v26  ;;  %v894_v33 = vpop.permute.xlu0 %893 }
 0x6cb   :  { %2888 = vmatprep.subr.msk.mxu1 %vm287_vm5, %v900_v28 }
 0x6cc   :  { %v3081_v29 = vpop.eup %3080 }
 0x6cd   :  { %v805_v32 = vmul.f32 %v3081_v29, %v3077_v20 }
 0x6d0   :  { %v3083_v30 = vpop.eup %3082 }
 0x6d1   :  { %v804_v31 = vmul.f32 %v3083_v30, %v3079_v22 }
 0x6d3   :  { %2885 = vmatprep.mubr.msk.f32.mxu1 %vm375_vm6, %v804_v31 }
 0x6d4   :  { %2886 = vmatmul.mubr.msk.f32.vlgmr.msra.gmra.mxu1 %vm375_vm6, %v805_v32 }
 0x6d5   :  { %2889 = vmatpush3.xpose.msk.msra.mxu1 %vm287_vm5, %v900_v28  ;;  %2892 = vmatprep.mubr.msk.f32.mxu1 %vm287_vm5, %v894_v33 }
 0x6d6   :  { %2890 = vmatprep.subr.msk.mxu1 %vm287_vm5, %v898_v34 }
 0x6d9   :  { %2891 = vmatpush3.xpose.msk.msra.mxu1 %vm287_vm5, %v898_v34 }
 0x6da   :  { %2913 = vmatprep.subr.mxu1 %v3402_v14 }
 0x6dc   :  { %2893 = vmatmul.mubr.msk.f32.vlgmr.msra.gmra.mxu1 %vm287_vm5, %v896_v35 }
 0x6dd   :  { %2914 = vmatpush3.msra.mxu1 %v3402_v14 }
 0x6de   :  { %2915 = vmatprep.subr.mxu1 %v3407_v15 }
 0x6df   :  { %2916 = vmatpush3.msra.mxu1 %v3407_v15 }
 0x6e0   :  { %2917 = vmatprep.subr.mxu1 %v3414_v16 }
 0x6e1   :  { %2918 = vmatpush3.msra.mxu1 %v3414_v16 }
 0x6e2   :  { %2919 = vmatprep.subr.mxu1 %v3423_v17 }
 0x6e3   :  { %2920 = vmatpush3.msra.mxu1 %v3423_v17 }
 0x794   :  { %v2887_v36 = vpop.f32.mrf.mxu1 }
 0x796   :  { %v884_v37 = vpop.f32.mrf.mxu1 }
 0x79c   :  { %v2894_v38 = vpop.f32.mrf.mxu1 }
 0x79d   :  { %v985_v39 = vmul.f32 0.35355338, %v2894_v38 }
 0x79e   :  { %v975_v40 = vpop.f32.mrf.mxu1 }
 0x79f   :  { %v984_v41 = vmul.f32 0.35355338, %v975_v40  ;;  %v987_v42 = vadd.f32 %v985_v39, %v3472_v56 }
 0x7a1   :  { %v991_v43 = vsel %vm375_vm6, %v987_v42, -inf  ;;  %v986_v45 = vadd.f32 %v984_v41, %v3474_v59 }
 0x7a2   :  { %992 = vmax.xlane.f32.xlu1 %v991_v43 }
 0x7a3   :  { %v988_v47 = vsel %vm375_vm6, %v986_v45, -inf }
 0x7a4   :  { %989 = vmax.xlane.f32.xlu0 %v988_v47 }
 0x7b3   :  { %1010 = vrot.lane.b32.xlu1 %v3444_v48, %s3264_s0 }
 0x7b7   :  { %1099 = vrot.lane.b32.xlu1 %v3516_v63, %s3251_s1 }
 0x7bb   :  { %1101 = vrot.lane.b32.xlu1 %v3514_v62, %s3251_s1 }
 0x7bf   :  { %1109 = vrot.lane.b32.xlu1 %v2887_v36, %s3265_s28 }
 0x82b   :  { %v993_v56 = vpop.xlane.xlu1 %992 }
 0x82c   :  { %v995_v49 = vsub.f32 %v987_v42, %v993_v56 }
 0x82d   :  { %v990_v50 = vpop.xlane.xlu0 %989 }
 0x82e   :  { %v998_v59 = vmul.f32 1.442695, %v995_v49  ;;  %v994_v51 = vsub.f32 %v986_v45, %v990_v50  ;;  %v118_v49 = vld [vmem:[#allocation5 + $0x8] sm:$0xff] }
 0x82f   :  { %v1011_v63 = vpop.permute.xlu1 %1010 }
 0x830   :  { %3084 = vpow2.f32 %v998_v59  ;;  %v996_v52 = vmul.f32 1.442695, %v994_v51 }
 0x832   :  { %3086 = vpow2.f32 %v996_v52 }
 0x833   :  { %v1100_v11 = vpop.permute.xlu1 %1099 }
 0x834   :  { %v1121_v19 = vsel %vm287_vm5, %v3512_v61, %v1100_v11  ;;  %v3609_v61 = vld [vmem:[%s3886_s13] ss:$0 sm:$0xff] }
 0x837   :  { %v1102_v12 = vpop.permute.xlu1 %1101 }
 0x838   :  { %v1122_v21 = vsel %vm287_vm5, %v3510_v60, %v1102_v12 }
 0x83b   :  { %v1110_v13 = vpop.permute.xlu1 %1109 }
 0x83c   :  { %v1124_v24 = vsel %vm375_vm6, %v1122_v21, %v1110_v13 }
 0x83d   :  { %v3085_v53 = vpop.eup %3084 }
 0x83e   :  { %v1003_v48 = vsel %vm375_vm6, %v3085_v53, 0.0 }
 0x83f   :  { %v3087_v54 = vpop.eup %3086  ;;  %1004 = vadd.xlane.f32.xlu0 %v1003_v48 }
 0x840   :  { %v1000_v55 = vsel %vm375_vm6, %v3087_v54, 0.0 }
 0x843   :  { %1001 = vadd.xlane.f32.xlu0 %v1000_v55 }
 0x859   :  { %1012 = vrot.lane.b32.xlu0 %v3441_v46, %s3264_s0  ;;  %v3569_v46 = vld [vmem:[%s3885_s12 + $0x18] sm:$0xff] }
 0x85d   :  { %1107 = vrot.lane.b32.xlu0 %v884_v37, %s3265_s28 }
 0x8c8   :  { %v1005_v57 = vpop.xlane.xlu0 %1004 }
 0x8c9   :  { %3088 = vrcp.f32 %v1005_v57 }
 0x8cc   :  { %v1002_v58 = vpop.xlane.xlu0 %1001 }
 0x8cd   :  { %3090 = vrcp.f32 %v1002_v58 }
 0x8d0   :  { %v1013_v62 = vpop.permute.xlu0 %1012 }
 0x8d1   :  { %2895 = vmatprep.subr.mxu0 %v1013_v62 }
 0x8d2   :  { %2896 = vmatpush3.msra.mxu0 %v1013_v62 }
 0x8d3   :  { %2897 = vmatprep.subr.mxu0 %v1011_v63 }
 0x8d4   :  { %2898 = vmatpush3.msra.mxu0 %v1011_v63  ;;  %v1108_v18 = vpop.permute.xlu0 %1107 }
 0x8d5   :  { %2902 = vmatprep.subr.mxu0 %v3569_v46  ;;  %v1123_v22 = vsel %vm375_vm6, %v1121_v19, %v1108_v18 }
 0x8d6   :  { %v3089_v2 = vpop.eup %3088 }
 0x8d7   :  { %v1009_v5 = vmul.f32 %v3089_v2, %v3085_v53  ;;  %v2685_v2 = vld [vmem:[%s3879_s6] ss:$0 sm:$0xff] }
 0x8da   :  { %v3091_v3 = vpop.eup %3090 }
 0x8db   :  { %v1008_v4 = vmul.f32 %v3091_v3, %v3087_v54 }
 0x8dd   :  { %2899 = vmatprep.mubr.msk.f32.mxu0 %vm375_vm6, %v1008_v4 }
 0x8de   :  { %2900 = vmatmul.mubr.msk.f32.vlgmr.msra.gmra.mxu0 %vm375_vm6, %v1009_v5  ;;  %v2686_v5 = vld [vmem:[%s3880_s7] ss:$0 sm:$0xff] }
 0x8df   :  { %2903 = vmatpush3.msra.mxu0 %v3569_v46 }
 0x8e0   :  { %2904 = vmatprep.subr.mxu0 %v3574_v6 }
 0x8e1   :  { %2905 = vmatpush3.msra.mxu0 %v3574_v6 }
 0x8e2   :  { %2906 = vmatprep.subr.mxu0 %v3583_v7 }
 0x8e3   :  { %2907 = vmatpush3.msra.mxu0 %v3583_v7 }
 0x8e4   :  { %2908 = vmatprep.subr.mxu0 %v3590_v8 }
 0x8e5   :  { %2909 = vmatpush3.msra.mxu0 %v3590_v8 }
 0x99e   :  { %v2901_v9 = vpop.f32.mrf.mxu0 }
 0x99f   :  { %1117 = vrot.lane.b32.xlu1 %v2901_v9, %s3266_s26 }
 0x9a0   :  { %v1088_v10 = vpop.f32.mrf.mxu0 }
 0x9a1   :  { %1115 = vrot.lane.b32.xlu0 %v1088_v10, %s3266_s26 }
 0xa11   :  { %v1118_v20 = vpop.permute.xlu1 %1117 }
 0xa12   :  { %v1127_v26 = vsel %vm1125_vm7, %v1124_v24, %v1118_v20 }
 0xa13   :  { %v1116_v23 = vpop.permute.xlu0 %1115 }
 0xa14   :  { %v1126_v25 = vsel %vm1125_vm7, %v1123_v22, %v1116_v23 }
 0xa15   :  { %2910 = vmatprep.mubr.msk.f32.mxu0 %vm135_vm0, %v1126_v25 }
 0xa16   :  { %2911 = vmatmul.mubr.msk.f32.vlgmr.msra.gmra.mxu0 %vm135_vm0, %v1127_v26 }
 0xad6   :  { %v2912_v27 = vpop.f32.mrf.mxu0 }
 0xad7   :  { %v1212_v60 = vadd.f32 %v2912_v27, %v3609_v61 }
 0xad8   :  { %v1206_v28 = vpop.f32.mrf.mxu0 }
 0xad9   :  { %v3613_v29 = vadd.f32 %v1212_v60, %v3389_v1  ;;  %v1207_v30 = vadd.f32 %v3609_v61, %v1206_v28 }
 0xadb   :  { %v3617_v31 = vadd.f32 %v1207_v30, %v3387_v0  ;;  %v1222_v32 = vsel %vm135_vm0, %v3613_v29, 0.0 }
 0xadc   :  { %1223 = vadd.xlane.f32.xlu1 %v1222_v32 }
 0xadd   :  { %v1219_v33 = vsel %vm135_vm0, %v3617_v31, 0.0 }
 0xade   :  { %1220 = vadd.xlane.f32.xlu0 %v1219_v33  ;;  %v3683_v33 = vld [vmem:[#allocation8 + $0x8] sm:$0xff] }
 0xaed   :  { %1364 = vrot.lane.b32.xlu1 %v3407_v15, %s3254_s4 }
 0xaf1   :  { %1362 = vrot.lane.b32.xlu1 %v3414_v16, %s3254_s4  ;;  %v117_v16 = vld [vmem:[#allocation5] sm:$0xff] }
 0xaf2   :  { %2932 = vmatprep.mubr.msk.f32.mxu0 %vm135_vm0, %v117_v16 }
 0xaf5   :  { %1360 = vrot.lane.b32.xlu1 %v3423_v17, %s3254_s4 }
 0xb65   :  { %v1224_v1 = vpop.xlane.xlu1 %1223 }
 0xb66   :  { %v1226_v0 = vmul.f32 0.03125, %v1224_v1 }
 0xb67   :  { %v1221_v34 = vpop.xlane.xlu0 %1220 }
 0xb68   :  { %v1225_v35 = vmul.f32 0.03125, %v1221_v34  ;;  %v1228_v36 = vsub.f32 %v3613_v29, %v1226_v0  ;;  %v3685_v34 = vld [vmem:[#allocation8] sm:$0xff] }
 0xb69   :  { %v1365_v41 = vpop.permute.xlu1 %1364 }
 0xb6a   :  { %v1227_v37 = vsub.f32 %v3617_v31, %v1225_v35  ;;  %v1230_v40 = vmul.f32 %v1228_v36, %v1228_v36  ;;  %v1260_v10 = vmul.f32 %v2685_v2, %v1228_v36 }
 0xb6c   :  { %v1229_v38 = vmul.f32 %v1227_v37, %v1227_v37  ;;  %v1234_v15 = vsel %vm135_vm0, %v1230_v40, 0.0  ;;  %v1259_v3 = vmul.f32 %v2685_v2, %v1227_v37 }
 0xb6d   :  { %v1363_v47 = vpop.permute.xlu1 %1362 }
 0xb6e   :  { %v1231_v39 = vsel %vm135_vm0, %v1229_v38, 0.0 }
 0xb6f   :  { %1232 = vadd.xlane.f32.xlu0 %v1231_v39 }
 0xb73   :  { %1235 = vadd.xlane.f32.xlu0 %v1234_v15 }
 0xb89   :  { %1366 = vrot.lane.b32.xlu0 %v3402_v14, %s3254_s4  ;;  %v1361_v14 = vpop.permute.xlu1 %1360 }
 0xb8d   :  { %1372 = vrot.lane.b32.xlu0 %v3438_v44, %s3254_s4 }
 0xbf8   :  { %v1233_v17 = vpop.xlane.xlu0 %1232 }
 0xbf9   :  { %v1237_v42 = vmul.f32 0.032258064, %v1233_v17 }
 0xbfb   :  { %3092 = vrsqrt.f32 %v1237_v42  ;;  %vm1241_vm8 = vcmp.eq.f32.partialorder %v1237_v42, inf  ;;  %v1244_v51 = vand.u32 2147483648, %v1237_v42  ;;  %vm1243_vm9 = vcmp.eq.f32.partialorder %v1237_v42, 0.0 }
 0xbfc   :  { %v1236_v43 = vpop.xlane.xlu0 %1235 }
 0xbfd   :  { %v1238_v45 = vmul.f32 0.032258064, %v1236_v43 }
 0xbff   :  { %3094 = vrsqrt.f32 %v1238_v45  ;;  %vm1248_vm10 = vcmp.eq.f32.partialorder %v1238_v45, inf  ;;  %v1251_v57 = vand.u32 2147483648, %v1238_v45  ;;  %vm1250_vm11 = vcmp.eq.f32.partialorder %v1238_v45, 0.0 }
 0xc00   :  { %v1367_v56 = vpop.permute.xlu0 %1366 }
 0xc01   :  { %2924 = vmatprep.subr.mxu0 %v1367_v56 }
 0xc02   :  { %2925 = vmatpush3.msra.mxu0 %v1367_v56 }
 0xc03   :  { %2926 = vmatprep.subr.mxu0 %v1365_v41 }
 0xc04   :  { %2927 = vmatpush3.msra.mxu0 %v1365_v41  ;;  %v1373_v19 = vpop.permute.xlu0 %1372 }
 0xc05   :  { %2928 = vmatprep.subr.mxu0 %v1363_v47 }
 0xc06   :  { %2929 = vmatpush3.msra.mxu0 %v1363_v47 }
 0xc07   :  { %2930 = vmatprep.subr.mxu0 %v1361_v14 }
 0xc08   :  { %v3093_v50 = vpop.eup %3092  ;;  %2931 = vmatpush3.msra.mxu0 %v1361_v14 }
 0xc09   :  { %v1240_v59 = vmul.f32 %v3093_v50, %v1237_v42  ;;  %2933 = vmatmul.mubr.msk.f32.vlgmr.msra.gmra.mxu0 %vm135_vm0, %v118_v49 }
 0xc0b   :  { %v1242_v52 = vsel %vm1241_vm8, %v1237_v42, %v1240_v59 }
 0xc0c   :  { %v3095_v53 = vpop.eup %3094  ;;  %v1245_v48 = vsel %vm1243_vm9, %v1244_v51, %v1242_v52 }
 0xc0d   :  { %v1261_v54 = vadd.f32 1e-06, %v1245_v48  ;;  %v1247_v55 = vmul.f32 %v3095_v53, %v1238_v45 }
 0xc0f   :  { %3096 = vrcp.f32 %v1261_v54  ;;  %v1249_v58 = vsel %vm1248_vm10, %v1238_v45, %v1247_v55 }
 0xc10   :  { %v1252_v62 = vsel %vm1250_vm11, %v1251_v57, %v1249_v58 }
 0xc11   :  { %v1262_v63 = vadd.f32 1e-06, %v1252_v62 }
 0xc13   :  { %3098 = vrcp.f32 %v1262_v63 }
 0xc1c   :  { %v3097_v4 = vpop.eup %3096 }
 0xc1d   :  { %v1264_v9 = vmul.f32 %v3097_v4, %v1259_v3 }
 0xc1f   :  { %v1273_v11 = vadd.f32 %v2686_v5, %v1264_v9 }
 0xc20   :  { %v3099_v12 = vpop.eup %3098 }
 0xc21   :  { %v1266_v13 = vmul.f32 %v3099_v12, %v1260_v10  ;;  %2921 = vmatprep.mubr.msk.f32.mxu1 %vm135_vm0, %v1273_v11 }
 0xc23   :  { %v1274_v18 = vadd.f32 %v2686_v5, %v1266_v13 }
 0xc25   :  { %2922 = vmatmul.mubr.msk.f32.vlgmr.msra.gmra.mxu1 %vm135_vm0, %v1274_v18 }
 0xcc9   :  { %v2934_v20 = vpop.f32.mrf.mxu0 }
 0xcca   :  { %v3647_v21 = vadd.f32 %v2934_v20, %v1373_v19 }
 0xccb   :  { %v1447_v22 = vpop.f32.mrf.mxu0 }
 0xccc   :  { %1662 = vrot.lane.b32.xlu1 %v3647_v21, %s3255_s5  ;;  %2935 = vmatprep.subr.msk.mxu1 %vm287_vm5, %v3647_v21  ;;  %v3653_v23 = vadd.f32 %v1447_v22, %v1373_v19 }
 0xccd   :  { %2936 = vmatpush3.xpose.msk.msra.mxu1 %vm287_vm5, %v3647_v21 }
 0xcce   :  { %1660 = vrot.lane.b32.xlu0 %v3653_v23, %s3255_s5  ;;  %2937 = vmatprep.subr.msk.mxu1 %vm287_vm5, %v3653_v23 }
 0xcd1   :  { %2938 = vmatpush3.xpose.msk.msra.mxu1 %vm287_vm5, %v3653_v23 }
 0xce5   :  { %v2923_v24 = vpop.f32.mrf.mxu1 }
 0xce6   :  { %v3664_v25 = vadd.f32 %v2923_v24, %v3438_v44 }
 0xce7   :  { %v1347_v26 = vpop.f32.mrf.mxu1 }
 0xce8   :  { %v3667_v27 = vadd.f32 %v3438_v44, %v1347_v26  ;;  %1658 = vrot.lane.b32.xlu0 %v3664_v25, %s3255_s5 }
 0xcea   :  { %2939 = vmatprep.mubr.msk.f32.mxu1 %vm287_vm5, %v3667_v27  ;;  %1656 = vrot.lane.b32.xlu1 %v3667_v27, %s3255_s5 }
 0xceb   :  { %2940 = vmatmul.mubr.msk.f32.vlgmr.msra.gmra.mxu1 %vm287_vm5, %v3664_v25 }
 0xd3e   :  { %v1663_v60 = vpop.permute.xlu1 %1662 }
 0xd3f   :  { %2949 = vmatprep.subr.msk.mxu1 %vm287_vm5, %v1663_v60 }
 0xd40   :  { %2950 = vmatpush3.xpose.msk.msra.mxu1 %vm287_vm5, %v1663_v60  ;;  %v1661_v28 = vpop.permute.xlu0 %1660 }
 0xd41   :  { %2951 = vmatprep.subr.msk.mxu1 %vm287_vm5, %v1661_v28 }
 0xd44   :  { %2952 = vmatpush3.xpose.msk.msra.mxu1 %vm287_vm5, %v1661_v28 }
 0xd5a   :  { %v1659_v30 = vpop.permute.xlu0 %1658 }
 0xd5c   :  { %v1657_v44 = vpop.permute.xlu1 %1656 }
 0xd5d   :  { %2953 = vmatprep.mubr.msk.f32.mxu1 %vm287_vm5, %v1657_v44 }
 0xd5e   :  { %2954 = vmatmul.mubr.msk.f32.vlgmr.msra.gmra.mxu1 %vm287_vm5, %v1659_v30 }
 0xdab   :  { %v2941_v32 = vpop.f32.mrf.mxu1 }
 0xdac   :  { %v1544_v1 = vmul.f32 0.35355338, %v2941_v32 }
 0xdad   :  { %v1534_v0 = vpop.f32.mrf.mxu1 }
 0xdae   :  { %v1543_v35 = vmul.f32 0.35355338, %v1534_v0  ;;  %v1546_v36 = vadd.f32 %v1544_v1, %v3683_v33 }
 0xdb0   :  { %v1550_v37 = vsel %vm375_vm6, %v1546_v36, -inf  ;;  %v1545_v38 = vadd.f32 %v1543_v35, %v3685_v34 }
 0xdb1   :  { %1551 = vmax.xlane.f32.xlu0 %v1550_v37 }
 0xdb2   :  { %v1547_v39 = vsel %vm375_vm6, %v1545_v38, -inf }
 0xdb3   :  { %1548 = vmax.xlane.f32.xlu1 %v1547_v39 }
 0xdc4   :  { %1571 = vrot.lane.b32.xlu1 %v3647_v21, %s3254_s4 }
 0xdc8   :  { %1775 = vrot.lane.b32.xlu1 %v3647_v21, %s3256_s11 }
 0xdcc   :  { %1773 = vrot.lane.b32.xlu1 %v3653_v23, %s3256_s11 }
 0xdd0   :  { %1866 = vrot.lane.b32.xlu1 %v3647_v21, %s3260_s25 }
 0xe1e   :  { %v2955_v40 = vpop.f32.mrf.mxu1 }
 0xe1f   :  { %v1748_v16 = vmul.f32 0.35355338, %v2955_v40 }
 0xe20   :  { %v1738_v15 = vpop.f32.mrf.mxu1 }
 0xe21   :  { %v1747_v17 = vmul.f32 0.35355338, %v1738_v15  ;;  %v1750_v43 = vadd.f32 %v1748_v16, %v3683_v33 }
 0xe23   :  { %v1749_v41 = vadd.f32 %v1747_v17, %v3685_v34  ;;  %v1754_v45 = vsel %vm375_vm6, %v1750_v43, -inf }
 0xe25   :  { %v1751_v42 = vsel %vm375_vm6, %v1749_v41, -inf }
 0xe26   :  { %1752 = vmax.xlane.f32.xlu0 %v1751_v42 }
 0xe2a   :  { %1755 = vmax.xlane.f32.xlu0 %v1754_v45 }
 0xe3a   :  { %v1552_v50 = vpop.xlane.xlu0 %1551 }
 0xe3b   :  { %v1554_v59 = vsub.f32 %v1546_v36, %v1552_v50 }
 0xe3c   :  { %v1549_v47 = vpop.xlane.xlu1 %1548 }
 0xe3d   :  { %v1553_v56 = vsub.f32 %v1545_v38, %v1549_v47  ;;  %v1557_v51 = vmul.f32 1.442695, %v1554_v59 }
 0xe3f   :  { %v1555_v14 = vmul.f32 1.442695, %v1553_v56 }
 0xe40   :  { %1569 = vrot.lane.b32.xlu0 %v3653_v23, %s3254_s4  ;;  %v1572_v49 = vpop.permute.xlu1 %1571 }
 0xe41   :  { %3100 = vpow2.f32 %v1555_v14  ;;  %2942 = vmatprep.subr.mxu0 %v1572_v49 }
 0xe42   :  { %2943 = vmatpush3.msra.mxu0 %v1572_v49  ;;  %3102 = vpow2.f32 %v1557_v51 }
 0xe44   :  { %v1776_v4 = vpop.permute.xlu1 %1775 }
 0xe48   :  { %v1774_v12 = vpop.permute.xlu1 %1773 }
 0xe4c   :  { %v1867_v13 = vpop.permute.xlu1 %1866 }
 0xe4e   :  { %v3101_v52 = vpop.eup %3100 }
 0xe4f   :  { %v1559_v53 = vsel %vm375_vm6, %v3101_v52, 0.0  ;;  %v3103_v48 = vpop.eup %3102 }
 0xe50   :  { %1560 = vadd.xlane.f32.xlu1 %v1559_v53  ;;  %v1562_v54 = vsel %vm375_vm6, %v3103_v48, 0.0 }
 0xe5f   :  { %1563 = vadd.xlane.f32.xlu0 %v1562_v54 }
 0xeaf   :  { %v1753_v55 = vpop.xlane.xlu0 %1752 }
 0xeb0   :  { %v1757_v57 = vsub.f32 %v1749_v41, %v1753_v55 }
 0xeb2   :  { %v1759_v58 = vmul.f32 1.442695, %v1757_v57 }
 0xeb3   :  { %v1756_v62 = vpop.xlane.xlu0 %1755 }
 0xeb4   :  { %3104 = vpow2.f32 %v1759_v58  ;;  %v1758_v63 = vsub.f32 %v1750_v43, %v1756_v62 }
 0xeb6   :  { %v1761_v2 = vmul.f32 1.442695, %v1758_v63 }
 0xeb7   :  { %v1570_v3 = vpop.permute.xlu0 %1569 }
 0xeb8   :  { %3106 = vpow2.f32 %v1761_v2  ;;  %2944 = vmatprep.subr.mxu0 %v1570_v3 }
 0xeb9   :  { %2945 = vmatpush3.msra.mxu0 %v1570_v3 }
 0xeba   :  { %2956 = vmatprep.subr.mxu0 %v1776_v4 }
 0xec1   :  { %v3105_v5 = vpop.eup %3104 }
 0xec2   :  { %v1763_v9 = vsel %vm375_vm6, %v3105_v5, 0.0 }
 0xec3   :  { %1764 = vadd.xlane.f32.xlu1 %v1763_v9 }
 0xec5   :  { %v3107_v10 = vpop.eup %3106 }
 0xec6   :  { %v1766_v11 = vsel %vm375_vm6, %v3107_v10, 0.0 }
 0xec7   :  { %1767 = vadd.xlane.f32.xlu0 %v1766_v11 }
 0xed4   :  { %1860 = vrot.lane.b32.xlu1 %v3667_v27, %s3260_s25 }
 0xed9   :  { %v1561_v18 = vpop.xlane.xlu1 %1560 }
 0xeda   :  { %3108 = vrcp.f32 %v1561_v18 }
 0xedd   :  { %1864 = vrot.lane.b32.xlu0 %v3653_v23, %s3260_s25 }
 0xee1   :  { %1862 = vrot.lane.b32.xlu0 %v3664_v25, %s3260_s25 }
 0xee7   :  { %v3109_v19 = vpop.eup %3108 }
 0xee8   :  { %v1564_v20 = vpop.xlane.xlu0 %1563  ;;  %v1567_v22 = vmul.f32 %v3109_v19, %v3101_v52 }
 0xee9   :  { %3110 = vrcp.f32 %v1564_v20 }
 0xeea   :  { %2946 = vmatprep.mubr.msk.f32.mxu0 %vm375_vm6, %v1567_v22 }
 0xef6   :  { %v3111_v24 = vpop.eup %3110 }
 0xef7   :  { %v1568_v26 = vmul.f32 %v3111_v24, %v3103_v48 }
 0xef9   :  { %2947 = vmatmul.mubr.msk.f32.vlgmr.msra.gmra.mxu0 %vm375_vm6, %v1568_v26 }
 0xefa   :  { %2957 = vmatpush3.msra.mxu0 %v1776_v4 }
 0xefb   :  { %2958 = vmatprep.subr.mxu0 %v1774_v12 }
 0xefc   :  { %2959 = vmatpush3.msra.mxu0 %v1774_v12 }
 0xefd   :  { %2963 = vmatprep.subr.msk.mxu0 %vm287_vm5, %v1867_v13 }
 0xf4c   :  { %v1765_v60 = vpop.xlane.xlu1 %1764 }
 0xf4d   :  { %3112 = vrcp.f32 %v1765_v60 }
 0xf50   :  { %v1768_v28 = vpop.xlane.xlu0 %1767  ;;  %v1861_v0 = vpop.permute.xlu1 %1860 }
 0xf51   :  { %3114 = vrcp.f32 %v1768_v28 }
 0xf54   :  { %v1865_v35 = vpop.permute.xlu0 %1864 }
 0xf58   :  { %v1863_v36 = vpop.permute.xlu0 %1862 }
 0xf5a   :  { %v3113_v44 = vpop.eup %3112 }
 0xf5b   :  { %v1771_v30 = vmul.f32 %v3113_v44, %v3105_v5 }
 0xf5d   :  { %2960 = vmatprep.mubr.msk.f32.mxu0 %vm375_vm6, %v1771_v30 }
 0xf5e   :  { %v3115_v32 = vpop.eup %3114 }
 0xf5f   :  { %v1772_v1 = vmul.f32 %v3115_v32, %v3107_v10 }
 0xf61   :  { %2961 = vmatmul.mubr.msk.f32.vlgmr.msra.gmra.mxu0 %vm375_vm6, %v1772_v1 }
 0xf62   :  { %2964 = vmatpush3.xpose.msk.msra.mxu0 %vm287_vm5, %v1867_v13  ;;  %2967 = vmatprep.mubr.msk.f32.mxu0 %vm287_vm5, %v1861_v0 }
 0xf63   :  { %2965 = vmatprep.subr.msk.mxu0 %vm287_vm5, %v1865_v35 }
 0xf66   :  { %2966 = vmatpush3.xpose.msk.msra.mxu0 %vm287_vm5, %v1865_v35 }
 0xf69   :  { %2968 = vmatmul.mubr.msk.f32.vlgmr.msra.gmra.mxu0 %vm287_vm5, %v1863_v36 }
 0xfb9   :  { %v3725_v37 = vpop.f32.mrf.mxu0 }
 0xfbb   :  { %v3727_v38 = vpop.f32.mrf.mxu0 }
0x1021   :  { %v3729_v39 = vpop.f32.mrf.mxu0 }
0x1023   :  { %v3731_v40 = vpop.f32.mrf.mxu0 }
0x1029   :  { %v2969_v15 = vpop.f32.mrf.mxu0 }
0x102a   :  { %v1952_v16 = vmul.f32 0.35355338, %v2969_v15 }
0x102b   :  { %v1942_v17 = vpop.f32.mrf.mxu0 }
0x102c   :  { %v1951_v41 = vmul.f32 0.35355338, %v1942_v17  ;;  %v1954_v42 = vadd.f32 %v1952_v16, %v3683_v33 }
0x102e   :  { %v1958_v43 = vsel %vm375_vm6, %v1954_v42, -inf  ;;  %v1953_v45 = vadd.f32 %v1951_v41, %v3685_v34 }
0x102f   :  { %1959 = vmax.xlane.f32.xlu0 %v1958_v43 }
0x1030   :  { %v1955_v47 = vsel %vm375_vm6, %v1953_v45, -inf }
0x1031   :  { %1956 = vmax.xlane.f32.xlu1 %v1955_v47 }
0x1042   :  { %1979 = vrot.lane.b32.xlu1 %v3647_v21, %s3259_s24 }
0x1046   :  { %2070 = vrot.lane.b32.xlu1 %v3647_v21, %s3263_s29 }
0x104a   :  { %2068 = vrot.lane.b32.xlu1 %v3653_v23, %s3263_s29 }
0x104e   :  { %2064 = vrot.lane.b32.xlu1 %v3667_v27, %s3263_s29 }
0x10b8   :  { %v1960_v56 = vpop.xlane.xlu0 %1959 }
0x10b9   :  { %v1962_v14 = vsub.f32 %v1954_v42, %v1960_v56 }
0x10ba   :  { %v1957_v49 = vpop.xlane.xlu1 %1956 }
0x10bb   :  { %v1965_v50 = vmul.f32 1.442695, %v1962_v14  ;;  %v1961_v59 = vsub.f32 %v1953_v45, %v1957_v49 }
0x10bd   :  { %3116 = vpow2.f32 %v1965_v50  ;;  %v1963_v51 = vmul.f32 1.442695, %v1961_v59 }
0x10be   :  { %v1980_v52 = vpop.permute.xlu1 %1979 }
0x10bf   :  { %3118 = vpow2.f32 %v1963_v51  ;;  %2970 = vmatprep.subr.mxu1 %v1980_v52 }
0x10c0   :  { %2971 = vmatpush3.msra.mxu1 %v1980_v52 }
0x10c2   :  { %v2071_v62 = vpop.permute.xlu1 %2070 }
0x10c6   :  { %v2069_v63 = vpop.permute.xlu1 %2068 }
0x10ca   :  { %v3117_v53 = vpop.eup %3116  ;;  %v2065_v9 = vpop.permute.xlu1 %2064 }
0x10cb   :  { %v1970_v48 = vsel %vm375_vm6, %v3117_v53, 0.0 }
0x10cc   :  { %v3119_v54 = vpop.eup %3118  ;;  %1971 = vadd.xlane.f32.xlu0 %v1970_v48 }
0x10cd   :  { %v1967_v55 = vsel %vm375_vm6, %v3119_v54, 0.0 }
0x10d0   :  { %1968 = vadd.xlane.f32.xlu0 %v1967_v55 }
0x10e6   :  { %1977 = vrot.lane.b32.xlu0 %v3653_v23, %s3259_s24 }
0x10ea   :  { %2066 = vrot.lane.b32.xlu0 %v3664_v25, %s3263_s29 }
0x1155   :  { %v1972_v27 = vpop.xlane.xlu0 %1971 }
0x1156   :  { %3120 = vrcp.f32 %v1972_v27 }
0x1159   :  { %v1969_v57 = vpop.xlane.xlu0 %1968 }
0x115a   :  { %3122 = vrcp.f32 %v1969_v57 }
0x115d   :  { %v1978_v58 = vpop.permute.xlu0 %1977 }
0x115e   :  { %2972 = vmatprep.subr.mxu1 %v1978_v58 }
0x115f   :  { %2973 = vmatpush3.msra.mxu1 %v1978_v58 }
0x1160   :  { %2977 = vmatprep.subr.msk.mxu1 %vm287_vm5, %v2071_v62 }
0x1161   :  { %v2067_v25 = vpop.permute.xlu0 %2066 }
0x1163   :  { %v3121_v2 = vpop.eup %3120 }
0x1164   :  { %v1976_v5 = vmul.f32 %v3121_v2, %v3117_v53 }
0x1167   :  { %v3123_v3 = vpop.eup %3122 }
0x1168   :  { %v1975_v4 = vmul.f32 %v3123_v3, %v3119_v54 }
0x116a   :  { %2974 = vmatprep.mubr.msk.f32.mxu1 %vm375_vm6, %v1975_v4  ;;  %v2442_v4 = vld [vmem:[%s3887_s14 + $0x18] sm:$0xff] }
0x116b   :  { %2975 = vmatmul.mubr.msk.f32.vlgmr.msra.gmra.mxu1 %vm375_vm6, %v1976_v5  ;;  %v2441_v5 = vld [vmem:[%s3887_s14 + $0x10] sm:$0xff] }
0x116c   :  { %2978 = vmatpush3.xpose.msk.msra.mxu1 %vm287_vm5, %v2071_v62  ;;  %2981 = vmatprep.mubr.msk.f32.mxu1 %vm287_vm5, %v2065_v9  ;;  %v2440_v9 = vld [vmem:[%s3887_s14 + $0x8] sm:$0xff] }
0x116d   :  { %2979 = vmatprep.subr.msk.mxu1 %vm287_vm5, %v2069_v63 }
0x1170   :  { %2980 = vmatpush3.xpose.msk.msra.mxu1 %vm287_vm5, %v2069_v63 }
0x1171   :  { %3002 = vmatprep.subr.mxu1 %v2442_v4 }
0x1173   :  { %2982 = vmatmul.mubr.msk.f32.vlgmr.msra.gmra.mxu1 %vm287_vm5, %v2067_v25  ;;  %v2439_v25 = vld [vmem:[%s3887_s14] sm:$0xff] }
0x1174   :  { %3003 = vmatpush3.msra.mxu1 %v2442_v4 }
0x1175   :  { %3004 = vmatprep.subr.mxu1 %v2441_v5 }
0x1176   :  { %3005 = vmatpush3.msra.mxu1 %v2441_v5 }
0x1177   :  { %3006 = vmatprep.subr.mxu1 %v2440_v9 }
0x1178   :  { %3007 = vmatpush3.msra.mxu1 %v2440_v9 }
0x1179   :  { %3008 = vmatprep.subr.mxu1 %v2439_v25 }
0x117a   :  { %3009 = vmatpush3.msra.mxu1 %v2439_v25 }
0x122b   :  { %v2976_v10 = vpop.f32.mrf.mxu1 }
0x122d   :  { %v2055_v11 = vpop.f32.mrf.mxu1 }
0x1233   :  { %v2983_v12 = vpop.f32.mrf.mxu1 }
0x1234   :  { %v2156_v13 = vmul.f32 0.35355338, %v2983_v12  ;;  %v2538_v12 = vld [vmem:[%s3889_s16 + $0x28] sm:$0xff] }
0x1235   :  { %v2146_v18 = vpop.f32.mrf.mxu1 }
0x1236   :  { %v2155_v19 = vmul.f32 0.35355338, %v2146_v18  ;;  %v2158_v20 = vadd.f32 %v2156_v13, %v3683_v33  ;;  %v2537_v13 = vld [vmem:[%s3889_s16 + $0x20] sm:$0xff] }
0x1238   :  { %v2162_v22 = vsel %vm375_vm6, %v2158_v20, -inf  ;;  %v2157_v24 = vadd.f32 %v2155_v19, %v3685_v34 }
0x1239   :  { %2163 = vmax.xlane.f32.xlu0 %v2162_v22 }
0x123a   :  { %v2159_v26 = vsel %vm375_vm6, %v2157_v24, -inf }
0x123b   :  { %2160 = vmax.xlane.f32.xlu1 %v2159_v26 }
0x124c   :  { %2183 = vrot.lane.b32.xlu1 %v3647_v21, %s3262_s27 }
0x1250   :  { %2270 = vrot.lane.b32.xlu1 %v3731_v40, %s3251_s1 }
0x1254   :  { %2272 = vrot.lane.b32.xlu1 %v3729_v39, %s3251_s1 }
0x1258   :  { %2278 = vrot.lane.b32.xlu1 %v2055_v11, %s3265_s28  ;;  %v2539_v11 = vld [vmem:[%s3889_s16 + $0x30] sm:$0xff] }
0x12c2   :  { %v2164_v33 = vpop.xlane.xlu0 %2163 }
0x12c3   :  { %v2166_v60 = vsub.f32 %v2158_v20, %v2164_v33 }
0x12c4   :  { %v2161_v28 = vpop.xlane.xlu1 %2160 }
0x12c5   :  { %v2169_v44 = vmul.f32 1.442695, %v2166_v60  ;;  %v2165_v34 = vsub.f32 %v2157_v24, %v2161_v28 }
0x12c7   :  { %3124 = vpow2.f32 %v2169_v44  ;;  %v2167_v30 = vmul.f32 1.442695, %v2165_v34 }
0x12c8   :  { %v2184_v32 = vpop.permute.xlu1 %2183 }
0x12c9   :  { %3126 = vpow2.f32 %v2167_v30  ;;  %2984 = vmatprep.subr.mxu0 %v2184_v32 }
0x12ca   :  { %2985 = vmatpush3.msra.mxu0 %v2184_v32 }
0x12cc   :  { %v2271_v43 = vpop.permute.xlu1 %2270 }
0x12d4   :  { %v3125_v21 = vpop.eup %3124 }
0x12d5   :  { %v2174_v1 = vsel %vm375_vm6, %v3125_v21, 0.0 }
0x12d6   :  { %v3127_v0 = vpop.eup %3126  ;;  %2175 = vadd.xlane.f32.xlu0 %v2174_v1 }
0x12d7   :  { %v2171_v35 = vsel %vm375_vm6, %v3127_v0, 0.0 }
0x12da   :  { %2172 = vadd.xlane.f32.xlu0 %v2171_v35  ;;  %v2717_v35 = vld [vmem:[%s3881_s8] ss:$0 sm:$0xff] }
0x12f0   :  { %2181 = vrot.lane.b32.xlu0 %v3653_v23, %s3262_s27 }
0x12f4   :  { %2280 = vrot.lane.b32.xlu0 %v2976_v10, %s3265_s28  ;;  %v2540_v10 = vld [vmem:[%s3889_s16 + $0x38] sm:$0xff] }
0x135f   :  { %v2176_v36 = vpop.xlane.xlu0 %2175 }
0x1360   :  { %3128 = vrcp.f32 %v2176_v36 }
0x1363   :  { %v2173_v39 = vpop.xlane.xlu0 %2172 }
0x1364   :  { %3130 = vrcp.f32 %v2173_v39 }
0x1367   :  { %v2182_v40 = vpop.permute.xlu0 %2181 }
0x1368   :  { %2986 = vmatprep.subr.mxu0 %v2182_v40 }
0x1369   :  { %2987 = vmatpush3.msra.mxu0 %v2182_v40  ;;  %v2718_v40 = vld [vmem:[%s3882_s9] ss:$0 sm:$0xff] }
0x136a   :  { %2991 = vmatprep.subr.mxu0 %v3569_v46 }
0x136b   :  { %v2281_v45 = vpop.permute.xlu0 %2280 }
0x136d   :  { %v3129_v15 = vpop.eup %3128 }
0x136e   :  { %v2180_v41 = vmul.f32 %v3129_v15, %v3125_v21 }
0x1371   :  { %v3131_v16 = vpop.eup %3130 }
0x1372   :  { %v2179_v17 = vmul.f32 %v3131_v16, %v3127_v0 }
0x1374   :  { %2988 = vmatprep.mubr.msk.f32.mxu0 %vm375_vm6, %v2179_v17 }
0x1375   :  { %2989 = vmatmul.mubr.msk.f32.vlgmr.msra.gmra.mxu0 %vm375_vm6, %v2180_v41 }
0x1376   :  { %2992 = vmatpush3.msra.mxu0 %v3569_v46  ;;  %v2273_v46 = vpop.permute.xlu1 %2272 }
0x1377   :  { %2993 = vmatprep.subr.mxu0 %v3574_v6 }
0x1378   :  { %2994 = vmatpush3.msra.mxu0 %v3574_v6  ;;  %v2292_v6 = vsel %vm287_vm5, %v3727_v38, %v2271_v43  ;;  %v2536_v43 = vld [vmem:[%s3889_s16 + $0x18] sm:$0xff] }
0x1379   :  { %2995 = vmatprep.subr.mxu0 %v3583_v7 }
0x137a   :  { %2996 = vmatpush3.msra.mxu0 %v3583_v7  ;;  %v2279_v47 = vpop.permute.xlu1 %2278  ;;  %v2293_v7 = vsel %vm287_vm5, %v3725_v37, %v2273_v46  ;;  %v2535_v46 = vld [vmem:[%s3889_s16 + $0x10] sm:$0xff] }
0x137b   :  { %2997 = vmatprep.subr.mxu0 %v3590_v8  ;;  %v2294_v14 = vsel %vm375_vm6, %v2292_v6, %v2279_v47  ;;  %v2295_v49 = vsel %vm375_vm6, %v2293_v7, %v2281_v45  ;;  %v2534_v45 = vld [vmem:[%s3889_s16 + $0x8] sm:$0xff]  ;;  %v2533_v47 = vld [vmem:[%s3889_s16] sm:$0xff]  ;;  %s3267_s16 = smov [#allocation10]  }
0x137c   :  { %2998 = vmatpush3.msra.mxu0 %v3590_v8  ;;  %v2719_v6 = vld [vmem:[%s3888_s15] ss:$0 sm:$0xff]  ;;  %s2639_s27 = sshll.u32 %s3267_s16, 4  ;;  %s2640_s27 = int_to_ptr.vmem [resolvable:$true] %s2639_s27 }
0x137d   :  { %3013 = vmatprep.subr.mxu0 %v2540_v10  ;;  %s3220_s15 = scalar_lea.vmem %s2640_s27, 256  ;;  %p3225_p7 = scmp.lt.s32.totalorder %s2640_s27, %s2640_s27 }
0x137e   :  { %p3221_p6 = scmp.ne.s32.totalorder %s2640_s27, %s3220_s15  ;;  %p3226_p8 = scmp.lt.s32.totalorder %s3220_s15, %s3220_s15 }
0x1380   :  { %p3227_p9 = por %p3226_p8, %p3225_p7 }
0x1382   :  { %p3228_p10 = pnand %p3227_p9, %p3221_p6 }
0x1435   :  { %v2990_v23 = vpop.f32.mrf.mxu0 }
0x1436   :  { %2288 = vrot.lane.b32.xlu0 %v2990_v23, %s3266_s26 }
0x1437   :  { %v2259_v42 = vpop.f32.mrf.mxu0 }
0x1438   :  { %2286 = vrot.lane.b32.xlu1 %v2259_v42, %s3266_s26 }
0x14a8   :  { %v2289_v56 = vpop.permute.xlu0 %2288 }
0x14a9   :  { %v2297_v59 = vsel %vm1125_vm7, %v2295_v49, %v2289_v56 }
0x14aa   :  { %v2287_v8 = vpop.permute.xlu1 %2286 }
0x14ab   :  { %v2296_v50 = vsel %vm1125_vm7, %v2294_v14, %v2287_v8 }
0x14ac   :  { %2999 = vmatprep.mubr.msk.f32.mxu0 %vm135_vm0, %v2296_v50 }
0x14ad   :  { %3000 = vmatmul.mubr.msk.f32.vlgmr.msra.gmra.mxu0 %vm135_vm0, %v2297_v59  ;;  %v2722_v59 = vld [vmem:[%s3890_s17] ss:$0 sm:$0xff] }
0x14ae   :  { %3014 = vmatpush3.msra.mxu0 %v2540_v10 }
0x14af   :  { %3015 = vmatprep.subr.mxu0 %v2539_v11 }
0x14b0   :  { %3016 = vmatpush3.msra.mxu0 %v2539_v11 }
0x14b1   :  { %3017 = vmatprep.subr.mxu0 %v2538_v12 }
0x14b2   :  { %3018 = vmatpush3.msra.mxu0 %v2538_v12 }
0x14b3   :  { %3019 = vmatprep.subr.mxu0 %v2537_v13 }
0x14b4   :  { %3020 = vmatpush3.msra.mxu0 %v2537_v13 }
0x14b5   :  { %3021 = vmatprep.subr.mxu0 %v2536_v43 }
0x14b6   :  { %3022 = vmatpush3.msra.mxu0 %v2536_v43 }
0x14b7   :  { %3023 = vmatprep.subr.mxu0 %v2535_v46 }
0x14b8   :  { %3024 = vmatpush3.msra.mxu0 %v2535_v46 }
0x14b9   :  { %3025 = vmatprep.subr.mxu0 %v2534_v45 }
0x14ba   :  { %3026 = vmatpush3.msra.mxu0 %v2534_v45 }
0x14bb   :  { %3027 = vmatprep.subr.mxu0 %v2533_v47 }
0x14bc   :  { %3028 = vmatpush3.msra.mxu0 %v2533_v47 }
0x156d   :  { %v3001_v51 = vpop.f32.mrf.mxu0 }
0x156e   :  { %v2376_v38 = vadd.f32 %v3001_v51, %v3609_v61 }
0x156f   :  { %v2370_v52 = vpop.f32.mrf.mxu0 }
0x1570   :  { %v3799_v53 = vadd.f32 %v2376_v38, %v3613_v29  ;;  %v2371_v37 = vadd.f32 %v3609_v61, %v2370_v52 }
0x1572   :  { %v3803_v48 = vadd.f32 %v2371_v37, %v3617_v31  ;;  %v2386_v54 = vsel %vm135_vm0, %v3799_v53, 0.0 }
0x1573   :  { %2387 = vadd.xlane.f32.xlu0 %v2386_v54 }
0x1574   :  { %v2383_v55 = vsel %vm135_vm0, %v3803_v48, 0.0 }
0x1575   :  { %2384 = vadd.xlane.f32.xlu1 %v2383_v55 }
0x15fc   :  { %v2388_v27 = vpop.xlane.xlu0 %2387 }
0x15fd   :  { %v2390_v57 = vmul.f32 0.03125, %v2388_v27 }
0x15fe   :  { %v2385_v58 = vpop.xlane.xlu1 %2384 }
0x15ff   :  { %v2389_v62 = vmul.f32 0.03125, %v2385_v58  ;;  %v2392_v29 = vsub.f32 %v3799_v53, %v2390_v57 }
0x1601   :  { %v2391_v63 = vsub.f32 %v3803_v48, %v2389_v62  ;;  %v2394_v2 = vmul.f32 %v2392_v29, %v2392_v29  ;;  %v2424_v16 = vmul.f32 %v2717_v35, %v2392_v29 }
0x1603   :  { %v2393_v61 = vmul.f32 %v2391_v63, %v2391_v63  ;;  %v2398_v3 = vsel %vm135_vm0, %v2394_v2, 0.0  ;;  %v2423_v36 = vmul.f32 %v2717_v35, %v2391_v63 }
0x1605   :  { %v2395_v31 = vsel %vm135_vm0, %v2393_v61, 0.0 }
0x1606   :  { %2396 = vadd.xlane.f32.xlu0 %v2395_v31 }
0x160a   :  { %2399 = vadd.xlane.f32.xlu0 %v2398_v3 }
0x168f   :  { %v2397_v18 = vpop.xlane.xlu0 %2396 }
0x1690   :  { %v2401_v19 = vmul.f32 0.032258064, %v2397_v18 }
0x1692   :  { %3132 = vrsqrt.f32 %v2401_v19  ;;  %vm2405_vm12 = vcmp.eq.f32.partialorder %v2401_v19, inf  ;;  %v2408_v33 = vand.u32 2147483648, %v2401_v19  ;;  %vm2407_vm13 = vcmp.eq.f32.partialorder %v2401_v19, 0.0 }
0x1693   :  { %v2400_v20 = vpop.xlane.xlu0 %2399 }
0x1694   :  { %v2402_v22 = vmul.f32 0.032258064, %v2400_v20 }
0x1696   :  { %3134 = vrsqrt.f32 %v2402_v22  ;;  %vm2412_vm14 = vcmp.eq.f32.partialorder %v2402_v22, inf  ;;  %v2415_v32 = vand.u32 2147483648, %v2402_v22  ;;  %vm2414_vm15 = vcmp.eq.f32.partialorder %v2402_v22, 0.0 }
0x169f   :  { %v3133_v24 = vpop.eup %3132 }
0x16a0   :  { %v2404_v26 = vmul.f32 %v3133_v24, %v2401_v19 }
0x16a2   :  { %v2406_v60 = vsel %vm2405_vm12, %v2401_v19, %v2404_v26 }
0x16a3   :  { %v3135_v28 = vpop.eup %3134  ;;  %v2409_v44 = vsel %vm2407_vm13, %v2408_v33, %v2406_v60 }
0x16a4   :  { %v2425_v34 = vadd.f32 1e-06, %v2409_v44  ;;  %v2411_v30 = vmul.f32 %v3135_v28, %v2402_v22 }
0x16a6   :  { %3136 = vrcp.f32 %v2425_v34  ;;  %v2413_v21 = vsel %vm2412_vm14, %v2402_v22, %v2411_v30 }
0x16a7   :  { %v2416_v1 = vsel %vm2414_vm15, %v2415_v32, %v2413_v21 }
0x16a8   :  { %v2426_v0 = vadd.f32 1e-06, %v2416_v1 }
0x16aa   :  { %3138 = vrcp.f32 %v2426_v0 }
0x16b3   :  { %v3137_v39 = vpop.eup %3136 }
0x16b4   :  { %v2428_v15 = vmul.f32 %v3137_v39, %v2423_v36 }
0x16b6   :  { %v2437_v17 = vadd.f32 %v2718_v40, %v2428_v15 }
0x16b7   :  { %v3139_v41 = vpop.eup %3138 }
0x16b8   :  { %v2430_v23 = vmul.f32 %v3139_v41, %v2424_v16  ;;  %3010 = vmatprep.mubr.msk.f32.mxu1 %vm135_vm0, %v2437_v17 }
0x16ba   :  { %v2438_v42 = vadd.f32 %v2718_v40, %v2430_v23 }
0x16bc   :  { %3011 = vmatmul.mubr.msk.f32.vlgmr.msra.gmra.mxu1 %vm135_vm0, %v2438_v42 }
0x177c   :  { %v3012_v56 = vpop.f32.mrf.mxu1 }
0x177d   :  { %v2528_v7 = vadd.f32 %v3012_v56, %v2719_v6 }
0x177e   :  { %v2522_v14 = vpop.f32.mrf.mxu1 }
0x177f   :  { %v2523_v8 = vadd.f32 %v2719_v6, %v2522_v14  ;;  %v2532_v50 = vmax.f32 %v2528_v7, 0.0 }
0x1781   :  { %v2531_v49 = vmax.f32 %v2523_v8, 0.0 }
0x1783   :  { %3029 = vmatprep.mubr.msk.f32.mxu0 %vm2548_vm1, %v2531_v49 }
0x1784   :  { %3030 = vmatmul.mubr.msk.f32.vlgmr.msra.gmra.mxu0 %vm2548_vm1, %v2532_v50 }
0x1844   :  { %v3031_v51 = vpop.f32.mrf.mxu0 }
0x1845   :  { %v2627_v38 = vadd.f32 %v3031_v51, %v2722_v59 }
0x1846   :  { %v2621_v52 = vpop.f32.mrf.mxu0 }
0x1847   :  { %v2631_v37 = vadd.f32 %v2627_v38, %v3799_v53  ;;  %v2622_v54 = vadd.f32 %v2722_v59, %v2621_v52 }
0x1849   :  { %2633 = vst.msk [vmem:[#allocation10 + $0x8] sm:$0xff] %vm135_vm0, %v2631_v37  ;;  %v2630_v55 = vadd.f32 %v2622_v54, %v3803_v48 }
0x184b   :  { %2632 = vst.msk [vmem:[#allocation10] sm:$0xff] %vm135_vm0, %v2630_v55 }
0x184c   :  { %3231 = shalt.err (!%p3228_p10)
}
0x184d   :  { %2645 = dma.vmem_to_hbm [thread:$0]  %s2640_s27, 256, %s3891_s18, [#allocation4], %s3250_s19, %s3250_s19, %s3251_s1  }
0x184e   :  { %3246 = dma.done.wait [#allocation4], 256  }
0x184f   :  { %3247 = vsyncadd [#allocation4], 4294967040 }
0x1850   :  { %2649 = vsyncpa [#allocation3], 1 }
0x1851   :  { %2650 = vsyncpa [#allocation6], 1 }
0x1852   :  { %2651 = vsyncpa [#allocation9], 1 }
0x1853   :  { %2652 = vsyncpa [#allocation4], 1 }

</bundles_post_ra>
